<compile_context>
chip_gen: v6e
topology: v6e:2x2x1
jax: 0.10.0
libtpu: 0.0.40
codegen_flags: <defaults>
</compile_context>

<pallas_src>
import math
from functools import partial

import jax
import jax.numpy as jnp
from jax import lax
from jax.experimental import pallas as pl
from jax.experimental.pallas import tpu as pltpu


# ----------------------------------------------------------------------------
# In-kernel helpers
# ----------------------------------------------------------------------------
def _mlp_feature_major(x_feats, w0_ref, b0_ref, wh_ref, bh_ref, wo_ref, bo_ref,
                       mxu_dtype=None):
    """Fully-connected net, feature-major layout (features on sublanes, samples on
    lanes).  x_feats: tuple of (1, S) rows, one per input feature.
    Input / output layers are VPU broadcast-FMA + sublane reduce; hidden layers are
    (nodes, nodes) @ (nodes, S) MXU matmuls (optionally with bf16 operands)."""
    w0 = w0_ref[...]                                   # (nodes, in_dim)
    h = w0[:, 0:1] * x_feats[0]                        # (nodes, S) outer product
    for k in range(1, len(x_feats)):
        h = h + w0[:, k:k + 1] * x_feats[k]
    h = jnp.maximum(h + b0_ref[...], 0.0)

    n_hidden = wh_ref.shape[0]                         # static
    for l in range(n_hidden):
        w = wh_ref[l]
        if mxu_dtype is not None:
            z = jnp.dot(w.astype(mxu_dtype), h.astype(mxu_dtype),
                        preferred_element_type=jnp.float32)
        else:
            z = jnp.dot(w, h, preferred_element_type=jnp.float32)
        h = jnp.maximum(z + bh_ref[l], 0.0)

    # output layer (out_dim == 1): weighted sublane reduce instead of a K->1 matmul
    return jnp.sum(h * wo_ref[...], axis=0, keepdims=True) + bo_ref[...]   # (1, S)


def _metalayer_kernel(kwh_ref, hp_ref, x_ref, e0_ref, exp_ref, expT_ref,
                      nw0, nb0, nwh, nbh, nwo, nbo,
                      ew0, eb0, ewh, ebh, ewo, ebo,
                      en_ref, c3_ref,
                      *, N, W, res, n_seg, h_min, h_max, u0_scale, en_scale,
                      mxu_dtype):
    s = pl.program_id(0)                 # wavelength index
    kwh = kwh_ref[s]                     # k * wh for this wavelength (SMEM scalar)

    # hs = sigmoid(h_paras) * (h_max - h_min) + h_min
    hs_row = jax.nn.sigmoid(hp_ref[...]) * (h_max - h_min) + h_min          # (1, N)

    # neffs = neffnn(hs).  Independent of the Ey chain until the phase multiply,
    # so these tiny MXU matmuls overlap with the big Ey ones.
    neff_row = _mlp_feature_major((hs_row,), nw0, nb0, nwh, nbh, nwo, nbo,
                                  mxu_dtype=None)                           # (1, N)

    # gen_U0: modal fields Ey(h_i, x) for every (waveguide, window sample)
    expand = exp_ref[...]                                                   # (N, NW) 0/1
    hs_rep = jnp.dot(hs_row, expand, preferred_element_type=jnp.float32)    # (1, NW)
    ey_row = _mlp_feature_major((hs_rep, x_ref[...]), ew0, eb0, ewh, ebh,
                                ewo, ebo, mxu_dtype=mxu_dtype)              # (1, NW)

    # U0_i = u0_scale * sum_x Ey_i(x) * E0_window_i(x)  (segmented lane reduce as a
    # matmul against the transposed expand matrix)
    u0_row = u0_scale * jnp.dot(ey_row * e0_ref[...], expT_ref[...],
                                preferred_element_type=jnp.float32)         # (1, N)

    # COUPLING == False:  Uz = exp(i * neff * k * wh) * U0, real/imag fused on sublanes
    phase = neff_row * kwh                                                  # (1, N)
    row = lax.broadcasted_iota(jnp.int32, (2, 1), 0)
    uz2 = jnp.where(row == 0, jnp.cos(phase), jnp.sin(phase)) \
        * (en_scale * u0_row)                                               # (2, N)

    # per-sample contribution Uz_i * Ey_i(x), real & imag at once
    uz_rep = jnp.dot(uz2, expand, preferred_element_type=jnp.float32)       # (2, NW)
    contrib = uz_rep * ey_row                                               # (2, NW)

    # gen_En overlap-add WITHOUT the (NW, G) scatter matrix:
    # re-tile contributions to (2, N, W) in VMEM scratch, then n_seg shifted VPU adds
    # into the (2, N+n_seg, res) output view:  En[i+j, t] += contrib[i, j*res + t].
    for i in range(N):
        c3_ref[:, i, :] = contrib[:, i * W:(i + 1) * W]
    en_ref[...] = jnp.zeros((2, N + n_seg, res), jnp.float32)
    for j in range(n_seg):
        en_ref[:, j:j + N, :] = (en_ref[:, j:j + N, :]
                                 + c3_ref[:, :, j * res:(j + 1) * res])


# ----------------------------------------------------------------------------
# Host wrapper: one fused pallas_call, grid over wavelengths
# ----------------------------------------------------------------------------
def metalayer_forward(E0, h_paras, stacked_params, cfg):
    N, res, Knn = cfg["N"], cfg["res"], cfg["Knn"]
    nodes, layers = cfg["nodes"], cfg["layers"]
    n_seg = 2 * (Knn + 1)                 # periods covered by one waveguide's mode
    W = n_seg * res                       # modal-field window length
    NW = N * W
    G = (N + n_seg) * res                 # global field length
    L = len(cfg["lams"])
    assert cfg["modes"] == 1, "COUPLING=False path implemented for modes == 1"

    if cfg["COUPLING"]:
        # TODO(synk): COUPLING=True needs matrix inverse + matrix_exp.
        raise NotImplementedError("COUPLING=True branch not implemented")

    # ---- host-side constant / layout prep (done once, before the single launch) ----
    kwh = jnp.asarray([2.0 * math.pi / lam * cfg["wh"] for lam in cfg["lams"]],
                      jnp.float32)                                       # (L,)
    hp_row = jnp.asarray(h_paras, jnp.float32).reshape(1, N)

    r = jnp.arange(NW)
    wg = r // W                               # waveguide index per sample
    xw = r % W                                # position inside the window
    x_local = (jnp.arange(W, dtype=jnp.float32) - (W - 1) / 2.0) * cfg["dx"]
    x_row = x_local[xw].reshape(1, NW)                                   # local coords
    g_tgt = wg * res + xw                      # global grid index hit by sample r
    e0win_row = jnp.asarray(E0, jnp.float32)[g_tgt].reshape(1, NW)       # E0 windows
    expand = (wg[None, :] == jnp.arange(N)[:, None]).astype(jnp.float32)      # (N, NW)
    expand_t = expand.T                                                       # (NW, N)
    # NOTE: the old (NW, G) scatter matrix is gone (overlap-add done in-kernel).

    u0_scale = 2.0 * cfg["C_EPSILON"] * cfg["n_sub"] * cfg["dx"]
    en_scale = 1.0   # TODO(synk): exact gen_En normalization (n0/C_EPSILON/neff) missing

    npar = stacked_params["neff"]
    epar = stacked_params["ey"]

    inv2 = lambda s: (0, 0)            # wavelength-invariant 2-D inputs
    lam2 = lambda s: (s, 0, 0)         # per-wavelength params, leading L dim squeezed
    lam3 = lambda s: (s, 0, 0, 0)

    in_specs = [
        pl.BlockSpec(memory_space=pltpu.MemorySpace.SMEM),        # kwh (L,)
        pl.BlockSpec((1, N), inv2),                               # h_paras row
        pl.BlockSpec((1, NW), inv2),                              # local coords
        pl.BlockSpec((1, NW), inv2),                              # E0 windows
        pl.BlockSpec((N, NW), inv2),                              # expand
        pl.BlockSpec((NW, N), inv2),                              # expand^T
        # neff MLP params (stacked over wavelengths, leading dim squeezed)
        pl.BlockSpec((None, nodes, 1), lam2),
        pl.BlockSpec((None, nodes, 1), lam2),
        pl.BlockSpec((None, layers, nodes, nodes), lam3),
        pl.BlockSpec((None, layers, nodes, 1), lam3),
        pl.BlockSpec((None, nodes, 1), lam2),
        pl.BlockSpec((None, 1, 1), lam2),
        # Ey MLP params (stacked over wavelengths, leading dim squeezed)
        pl.BlockSpec((None, nodes, 2), lam2),
        pl.BlockSpec((None, nodes, 1), lam2),
        pl.BlockSpec((None, layers, nodes, nodes), lam3),
        pl.BlockSpec((None, layers, nodes, 1), lam3),
        pl.BlockSpec((None, nodes, 1), lam2),
        pl.BlockSpec((None, 1, 1), lam2),
    ]
    # single fused real/imag output, reshaped to (L, 2, G) on the host
    out_specs = pl.BlockSpec((None, 2, N + n_seg, res), lambda s: (s, 0, 0, 0))
    out_shape = jax.ShapeDtypeStruct((L, 2, N + n_seg, res), jnp.float32)

    kernel = partial(_metalayer_kernel,
                     N=N, W=W, res=res, n_seg=n_seg,
                     h_min=float(cfg["h_min"]), h_max=float(cfg["h_max"]),
                     u0_scale=float(u0_scale), en_scale=float(en_scale),
                     mxu_dtype=cfg.get("ey_mxu_dtype", jnp.bfloat16))

    # On v7x set cfg["core_parallel_lams"]=True so the two lambdas run on the two
    # TensorCores; default "arbitrary" is safe on every generation.
    dim_sem = ((pltpu.CORE_PARALLEL,) if cfg.get("core_parallel_lams", False)
               else ("arbitrary",))

    out = pl.pallas_call(
        kernel,
        grid=(L,),
        in_specs=in_specs,
        out_specs=out_specs,
        out_shape=out_shape,
        scratch_shapes=[pltpu.VMEM((2, N, W), jnp.float32)],   # contrib re-tile buffer
        compiler_params=pltpu.CompilerParams(dimension_semantics=dim_sem),
    )(kwh, hp_row, x_row, e0win_row, expand, expand_t,
      npar["w0"], npar["b0"], npar["wh"], npar["bh"], npar["wo"], npar["bo"],
      epar["w0"], epar["b0"], epar["wh"], epar["bh"], epar["wo"], epar["bo"])

    en = out.reshape(L, 2, G)
    return [en[s, 0] + 1j * en[s, 1] for s in range(L)]


# ----------------------------------------------------------------------------
# Parameter setup (deterministic synthetic weights, replaces the .npy loads)
# Feature-major layout: h_{l+1} = relu(W @ h_l + b) with W (out, in), b (out, 1).
# ----------------------------------------------------------------------------
def init_mlp_params(key, in_dim, out_dim, nodes, layers):
    k0, kh, ko = jax.random.split(key, 3)
    return dict(
        w0=jax.random.normal(k0, (nodes, in_dim), jnp.float32) / math.sqrt(in_dim),
        b0=jnp.zeros((nodes, 1), jnp.float32),
        wh=jax.random.normal(kh, (layers, nodes, nodes), jnp.float32) / math.sqrt(nodes),
        bh=jnp.zeros((layers, nodes, 1), jnp.float32),
        wo=jax.random.normal(ko, (nodes, out_dim), jnp.float32) / math.sqrt(nodes),
        bo=jnp.zeros((out_dim, 1), jnp.float32),
    )


def stack_over_lams(per_lam):
    return {k: jnp.stack([p[k] for p in per_lam], axis=0) for k in per_lam[0]}


# ----------------------------------------------------------------------------
if __name__ == "__main__":
    cfg = dict(
        N=8, res=16, Knn=1, modes=1, nodes=32, layers=2,
        h_min=0.12, h_max=0.30, wh=0.6, dx=0.05,
        n_sub=1.46, n0=1.0, C_EPSILON=1.0,
        lams=[0.532, 0.633],            # two wavelengths -> two Metalayer_sub's
        COUPLING=False,
        ey_mxu_dtype=jnp.bfloat16,      # bf16 MXU operands, f32 accumulation
        core_parallel_lams=False,       # set True on v7x (2 TC/chip)
    )
    key = jax.random.PRNGKey(0)
    k_hp, k_sub, k_e0 = jax.random.split(key, 3)

    N = cfg["N"]
    h_paras = 0.1 * jax.random.normal(k_hp, (N,), dtype=jnp.float32)

    per_lam_neff, per_lam_ey = [], []
    for sk in jax.random.split(k_sub, len(cfg["lams"])):
        k_neff, k_ey = jax.random.split(sk)
        per_lam_neff.append(init_mlp_params(k_neff, 1, cfg["modes"],
                                            cfg["nodes"], cfg["layers"]))
        per_lam_ey.append(init_mlp_params(k_ey, 2, 1, cfg["nodes"], cfg["layers"]))
    stacked = dict(neff=stack_over_lams(per_lam_neff), ey=stack_over_lams(per_lam_ey))

    # E0 size: (N + 2*(Knn+1)) * period_resolution
    G = (N + 2 * (cfg["Knn"] + 1)) * cfg["res"]
    E0 = jax.random.normal(k_e0, (G,), dtype=jnp.float32)

    Ens = metalayer_forward(E0, h_paras, stacked, cfg)
    Ens = [jax.block_until_ready(e) for e in Ens]

    assert len(Ens) == len(cfg["lams"])
    assert all(e.shape == (G,) and e.dtype == jnp.complex64 for e in Ens)
    assert all(bool(jnp.all(jnp.isfinite(jnp.abs(e)))) for e in Ens)
    print("KERNEL_OK")
</pallas_src>

<mosaic_0001>
module attributes {stable_mosaic.version = 11 : i64} {
  func.func @_metalayer_kernel(%arg0: i32, %arg1: memref<2xf32, #tpu.memory_space<smem>>, %arg2: memref<1x8xf32, #tpu.memory_space<vmem>>, %arg3: memref<1x512xf32, #tpu.memory_space<vmem>>, %arg4: memref<1x512xf32, #tpu.memory_space<vmem>>, %arg5: memref<8x512xf32, #tpu.memory_space<vmem>>, %arg6: memref<512x8xf32, #tpu.memory_space<vmem>>, %arg7: memref<1x32x1xf32, #tpu.memory_space<vmem>>, %arg8: memref<1x32x1xf32, #tpu.memory_space<vmem>>, %arg9: memref<1x2x32x32xf32, #tpu.memory_space<vmem>>, %arg10: memref<1x2x32x1xf32, #tpu.memory_space<vmem>>, %arg11: memref<1x32x1xf32, #tpu.memory_space<vmem>>, %arg12: memref<1x1x1xf32, #tpu.memory_space<vmem>>, %arg13: memref<1x32x2xf32, #tpu.memory_space<vmem>>, %arg14: memref<1x32x1xf32, #tpu.memory_space<vmem>>, %arg15: memref<1x2x32x32xf32, #tpu.memory_space<vmem>>, %arg16: memref<1x2x32x1xf32, #tpu.memory_space<vmem>>, %arg17: memref<1x32x1xf32, #tpu.memory_space<vmem>>, %arg18: memref<1x1x1xf32, #tpu.memory_space<vmem>>, %arg19: memref<1x2x12x16xf32, #tpu.memory_space<vmem>>, %arg20: memref<2x8x64xf32, #tpu.memory_space<vmem>>) attributes {dimension_semantics = [#tpu.dimension_semantics<arbitrary>], iteration_bounds = array<i64: 2>, scalar_prefetch = 0 : i64, scratch_operands = 1 : i64, tpu.core_type = #tpu.core_type<tc>, window_params = [{transform_indices = @transform_0, window_bounds = array<i64: 2>}, {pipeline_mode = #tpu.pipeline_mode<synchronous>, transform_indices = @transform_1, window_bounds = array<i64: 1, 8>}, {pipeline_mode = #tpu.pipeline_mode<synchronous>, transform_indices = @transform_2, window_bounds = array<i64: 1, 512>}, {pipeline_mode = #tpu.pipeline_mode<synchronous>, transform_indices = @transform_3, window_bounds = array<i64: 1, 512>}, {pipeline_mode = #tpu.pipeline_mode<synchronous>, transform_indices = @transform_4, window_bounds = array<i64: 8, 512>}, {pipeline_mode = #tpu.pipeline_mode<synchronous>, transform_indices = @transform_5, window_bounds = array<i64: 512, 8>}, {transform_indices = @transform_6, window_bounds = array<i64: 1, 32, 1>}, {transform_indices = @transform_7, window_bounds = array<i64: 1, 32, 1>}, {transform_indices = @transform_8, window_bounds = array<i64: 1, 2, 32, 32>}, {transform_indices = @transform_9, window_bounds = array<i64: 1, 2, 32, 1>}, {transform_indices = @transform_10, window_bounds = array<i64: 1, 32, 1>}, {transform_indices = @transform_11, window_bounds = array<i64: 1, 1, 1>}, {transform_indices = @transform_12, window_bounds = array<i64: 1, 32, 2>}, {transform_indices = @transform_13, window_bounds = array<i64: 1, 32, 1>}, {transform_indices = @transform_14, window_bounds = array<i64: 1, 2, 32, 32>}, {transform_indices = @transform_15, window_bounds = array<i64: 1, 2, 32, 1>}, {transform_indices = @transform_16, window_bounds = array<i64: 1, 32, 1>}, {transform_indices = @transform_17, window_bounds = array<i64: 1, 1, 1>}, {transform_indices = @transform_18, window_bounds = array<i64: 1, 2, 12, 16>}]} {
    %0 = arith.index_cast %arg0 : i32 to index
    %1 = memref.load %arg1[%0] : memref<2xf32, #tpu.memory_space<smem>>
    %c0 = arith.constant 0 : index
    %c0_0 = arith.constant 0 : index
    %2 = vector.load %arg2[%c0, %c0_0] : memref<1x8xf32, #tpu.memory_space<vmem>>, vector<1x8xf32>
    %3 = arith.negf %2 : vector<1x8xf32>
    %4 = math.exp %3 : vector<1x8xf32>
    %cst = arith.constant 1.000000e+00 : f32
    %5 = vector.broadcast %cst : f32 to vector<1x8xf32>
    %6 = arith.addf %5, %4 : vector<1x8xf32>
    %7 = arith.divf %5, %6 : vector<1x8xf32>
    %cst_1 = arith.constant 1.800000e-01 : f32
    %8 = vector.broadcast %cst_1 : f32 to vector<1x8xf32>
    %9 = arith.mulf %7, %8 : vector<1x8xf32>
    %cst_2 = arith.constant 1.200000e-01 : f32
    %10 = vector.broadcast %cst_2 : f32 to vector<1x8xf32>
    %11 = arith.addf %9, %10 : vector<1x8xf32>
    %c0_3 = arith.constant 0 : index
    %c0_4 = arith.constant 0 : index
    %c0_5 = arith.constant 0 : index
    %12 = vector.load %arg7[%c0_3, %c0_4, %c0_5] : memref<1x32x1xf32, #tpu.memory_space<vmem>>, vector<1x32x1xf32>
    %13 = vector.shape_cast %12 : vector<1x32x1xf32> to vector<32x1xf32>
    %14 = vector.broadcast %13 : vector<32x1xf32> to vector<32x8xf32>
    %15 = vector.broadcast %11 : vector<1x8xf32> to vector<32x8xf32>
    %16 = arith.mulf %14, %15 : vector<32x8xf32>
    %c0_6 = arith.constant 0 : index
    %c0_7 = arith.constant 0 : index
    %c0_8 = arith.constant 0 : index
    %17 = vector.load %arg8[%c0_6, %c0_7, %c0_8] : memref<1x32x1xf32, #tpu.memory_space<vmem>>, vector<1x32x1xf32>
    %18 = vector.shape_cast %17 : vector<1x32x1xf32> to vector<32x1xf32>
    %19 = vector.broadcast %18 : vector<32x1xf32> to vector<32x8xf32>
    %20 = arith.addf %16, %19 : vector<32x8xf32>
    %cst_9 = arith.constant 0.000000e+00 : f32
    %21 = vector.broadcast %cst_9 : f32 to vector<32x8xf32>
    %22 = arith.maximumf %20, %21 : vector<32x8xf32>
    %c0_10 = arith.constant 0 : index
    %c0_11 = arith.constant 0 : index
    %c0_12 = arith.constant 0 : index
    %c0_13 = arith.constant 0 : index
    %23 = vector.load %arg9[%c0_10, %c0_11, %c0_12, %c0_13] : memref<1x2x32x32xf32, #tpu.memory_space<vmem>>, vector<1x1x32x32xf32>
    %24 = vector.shape_cast %23 : vector<1x1x32x32xf32> to vector<32x32xf32>
    %cst_14 = arith.constant dense<0.000000e+00> : vector<32x8xf32>
    %25 = tpu.matmul %24, %22, %cst_14 {dimension_numbers = #tpu.dot_dimension_numbers<[1], [0], [0], [1], [0, 0, 1, 1], [], []>} : vector<32x32xf32>, vector<32x8xf32>, vector<32x8xf32> -> vector<32x8xf32>
    %c0_15 = arith.constant 0 : index
    %c0_16 = arith.constant 0 : index
    %c0_17 = arith.constant 0 : index
    %c0_18 = arith.constant 0 : index
    %26 = vector.load %arg10[%c0_15, %c0_16, %c0_17, %c0_18] : memref<1x2x32x1xf32, #tpu.memory_space<vmem>>, vector<1x1x32x1xf32>
    %27 = vector.shape_cast %26 : vector<1x1x32x1xf32> to vector<32x1xf32>
    %28 = vector.broadcast %27 : vector<32x1xf32> to vector<32x8xf32>
    %29 = arith.addf %25, %28 : vector<32x8xf32>
    %cst_19 = arith.constant 0.000000e+00 : f32
    %30 = vector.broadcast %cst_19 : f32 to vector<32x8xf32>
    %31 = arith.maximumf %29, %30 : vector<32x8xf32>
    %c0_20 = arith.constant 0 : index
    %c1 = arith.constant 1 : index
    %c0_21 = arith.constant 0 : index
    %c0_22 = arith.constant 0 : index
    %32 = vector.load %arg9[%c0_20, %c1, %c0_21, %c0_22] : memref<1x2x32x32xf32, #tpu.memory_space<vmem>>, vector<1x1x32x32xf32>
    %33 = vector.shape_cast %32 : vector<1x1x32x32xf32> to vector<32x32xf32>
    %cst_23 = arith.constant dense<0.000000e+00> : vector<32x8xf32>
    %34 = tpu.matmul %33, %31, %cst_23 {dimension_numbers = #tpu.dot_dimension_numbers<[1], [0], [0], [1], [0, 0, 1, 1], [], []>} : vector<32x32xf32>, vector<32x8xf32>, vector<32x8xf32> -> vector<32x8xf32>
    %c0_24 = arith.constant 0 : index
    %c1_25 = arith.constant 1 : index
    %c0_26 = arith.constant 0 : index
    %c0_27 = arith.constant 0 : index
    %35 = vector.load %arg10[%c0_24, %c1_25, %c0_26, %c0_27] : memref<1x2x32x1xf32, #tpu.memory_space<vmem>>, vector<1x1x32x1xf32>
    %36 = vector.shape_cast %35 : vector<1x1x32x1xf32> to vector<32x1xf32>
    %37 = vector.broadcast %36 : vector<32x1xf32> to vector<32x8xf32>
    %38 = arith.addf %34, %37 : vector<32x8xf32>
    %cst_28 = arith.constant 0.000000e+00 : f32
    %39 = vector.broadcast %cst_28 : f32 to vector<32x8xf32>
    %40 = arith.maximumf %38, %39 : vector<32x8xf32>
    %c0_29 = arith.constant 0 : index
    %c0_30 = arith.constant 0 : index
    %c0_31 = arith.constant 0 : index
    %41 = vector.load %arg11[%c0_29, %c0_30, %c0_31] : memref<1x32x1xf32, #tpu.memory_space<vmem>>, vector<1x32x1xf32>
    %42 = vector.shape_cast %41 : vector<1x32x1xf32> to vector<32x1xf32>
    %43 = vector.broadcast %42 : vector<32x1xf32> to vector<32x8xf32>
    %44 = arith.mulf %40, %43 : vector<32x8xf32>
    %cst_32 = arith.constant dense<0.000000e+00> : vector<8xf32>
    %45 = vector.multi_reduction <add>, %44, %cst_32 [0] : vector<32x8xf32> to vector<8xf32>
    %46 = vector.shape_cast %45 : vector<8xf32> to vector<1x8xf32>
    %c0_33 = arith.constant 0 : index
    %c0_34 = arith.constant 0 : index
    %c0_35 = arith.constant 0 : index
    %47 = vector.load %arg12[%c0_33, %c0_34, %c0_35] : memref<1x1x1xf32, #tpu.memory_space<vmem>>, vector<1x1x1xf32>
    %48 = vector.shape_cast %47 : vector<1x1x1xf32> to vector<1x1xf32>
    %49 = vector.broadcast %48 : vector<1x1xf32> to vector<1x8xf32>
    %50 = arith.addf %46, %49 : vector<1x8xf32>
    %c0_36 = arith.constant 0 : index
    %c0_37 = arith.constant 0 : index
    %51 = vector.load %arg5[%c0_36, %c0_37] : memref<8x512xf32, #tpu.memory_space<vmem>>, vector<8x512xf32>
    %cst_38 = arith.constant dense<0.000000e+00> : vector<1x512xf32>
    %52 = tpu.matmul %11, %51, %cst_38 {dimension_numbers = #tpu.dot_dimension_numbers<[1], [0], [0], [1], [0, 0, 1, 1], [], []>} : vector<1x8xf32>, vector<8x512xf32>, vector<1x512xf32> -> vector<1x512xf32>
    %c0_39 = arith.constant 0 : index
    %c0_40 = arith.constant 0 : index
    %53 = vector.load %arg3[%c0_39, %c0_40] : memref<1x512xf32, #tpu.memory_space<vmem>>, vector<1x512xf32>
    %c0_41 = arith.constant 0 : index
    %c0_42 = arith.constant 0 : index
    %c0_43 = arith.constant 0 : index
    %54 = vector.load %arg13[%c0_41, %c0_42, %c0_43] : memref<1x32x2xf32, #tpu.memory_space<vmem>>, vector<1x32x2xf32>
    %55 = vector.shape_cast %54 : vector<1x32x2xf32> to vector<32x2xf32>
    %56 = vector.extract_strided_slice %55 {offsets = [0, 0], sizes = [32, 1], strides = [1, 1]} : vector<32x2xf32> to vector<32x1xf32>
    %57 = vector.broadcast %56 : vector<32x1xf32> to vector<32x512xf32>
    %58 = vector.broadcast %52 : vector<1x512xf32> to vector<32x512xf32>
    %59 = arith.mulf %57, %58 : vector<32x512xf32>
    %60 = vector.extract_strided_slice %55 {offsets = [0, 1], sizes = [32, 1], strides = [1, 1]} : vector<32x2xf32> to vector<32x1xf32>
    %61 = vector.broadcast %60 : vector<32x1xf32> to vector<32x512xf32>
    %62 = vector.broadcast %53 : vector<1x512xf32> to vector<32x512xf32>
    %63 = arith.mulf %61, %62 : vector<32x512xf32>
    %64 = arith.addf %59, %63 : vector<32x512xf32>
    %c0_44 = arith.constant 0 : index
    %c0_45 = arith.constant 0 : index
    %c0_46 = arith.constant 0 : index
    %65 = vector.load %arg14[%c0_44, %c0_45, %c0_46] : memref<1x32x1xf32, #tpu.memory_space<vmem>>, vector<1x32x1xf32>
    %66 = vector.shape_cast %65 : vector<1x32x1xf32> to vector<32x1xf32>
    %67 = vector.broadcast %66 : vector<32x1xf32> to vector<32x512xf32>
    %68 = arith.addf %64, %67 : vector<32x512xf32>
    %cst_47 = arith.constant 0.000000e+00 : f32
    %69 = vector.broadcast %cst_47 : f32 to vector<32x512xf32>
    %70 = arith.maximumf %68, %69 : vector<32x512xf32>
    %c0_48 = arith.constant 0 : index
    %c0_49 = arith.constant 0 : index
    %c0_50 = arith.constant 0 : index
    %c0_51 = arith.constant 0 : index
    %71 = vector.load %arg15[%c0_48, %c0_49, %c0_50, %c0_51] : memref<1x2x32x32xf32, #tpu.memory_space<vmem>>, vector<1x1x32x32xf32>
    %72 = vector.shape_cast %71 : vector<1x1x32x32xf32> to vector<32x32xf32>
    %73 = arith.truncf %72 : vector<32x32xf32> to vector<32x32xbf16>
    %74 = arith.truncf %70 : vector<32x512xf32> to vector<32x512xbf16>
    %cst_52 = arith.constant dense<0.000000e+00> : vector<32x512xf32>
    %75 = tpu.matmul %73, %74, %cst_52 {dimension_numbers = #tpu.dot_dimension_numbers<[1], [0], [0], [1], [0, 0, 1, 1], [], []>} : vector<32x32xbf16>, vector<32x512xbf16>, vector<32x512xf32> -> vector<32x512xf32>
    %c0_53 = arith.constant 0 : index
    %c0_54 = arith.constant 0 : index
    %c0_55 = arith.constant 0 : index
    %c0_56 = arith.constant 0 : index
    %76 = vector.load %arg16[%c0_53, %c0_54, %c0_55, %c0_56] : memref<1x2x32x1xf32, #tpu.memory_space<vmem>>, vector<1x1x32x1xf32>
    %77 = vector.shape_cast %76 : vector<1x1x32x1xf32> to vector<32x1xf32>
    %78 = vector.broadcast %77 : vector<32x1xf32> to vector<32x512xf32>
    %79 = arith.addf %75, %78 : vector<32x512xf32>
    %cst_57 = arith.constant 0.000000e+00 : f32
    %80 = vector.broadcast %cst_57 : f32 to vector<32x512xf32>
    %81 = arith.maximumf %79, %80 : vector<32x512xf32>
    %c0_58 = arith.constant 0 : index
    %c1_59 = arith.constant 1 : index
    %c0_60 = arith.constant 0 : index
    %c0_61 = arith.constant 0 : index
    %82 = vector.load %arg15[%c0_58, %c1_59, %c0_60, %c0_61] : memref<1x2x32x32xf32, #tpu.memory_space<vmem>>, vector<1x1x32x32xf32>
    %83 = vector.shape_cast %82 : vector<1x1x32x32xf32> to vector<32x32xf32>
    %84 = arith.truncf %83 : vector<32x32xf32> to vector<32x32xbf16>
    %85 = arith.truncf %81 : vector<32x512xf32> to vector<32x512xbf16>
    %cst_62 = arith.constant dense<0.000000e+00> : vector<32x512xf32>
    %86 = tpu.matmul %84, %85, %cst_62 {dimension_numbers = #tpu.dot_dimension_numbers<[1], [0], [0], [1], [0, 0, 1, 1], [], []>} : vector<32x32xbf16>, vector<32x512xbf16>, vector<32x512xf32> -> vector<32x512xf32>
    %c0_63 = arith.constant 0 : index
    %c1_64 = arith.constant 1 : index
    %c0_65 = arith.constant 0 : index
    %c0_66 = arith.constant 0 : index
    %87 = vector.load %arg16[%c0_63, %c1_64, %c0_65, %c0_66] : memref<1x2x32x1xf32, #tpu.memory_space<vmem>>, vector<1x1x32x1xf32>
    %88 = vector.shape_cast %87 : vector<1x1x32x1xf32> to vector<32x1xf32>
    %89 = vector.broadcast %88 : vector<32x1xf32> to vector<32x512xf32>
    %90 = arith.addf %86, %89 : vector<32x512xf32>
    %cst_67 = arith.constant 0.000000e+00 : f32
    %91 = vector.broadcast %cst_67 : f32 to vector<32x512xf32>
    %92 = arith.maximumf %90, %91 : vector<32x512xf32>
    %c0_68 = arith.constant 0 : index
    %c0_69 = arith.constant 0 : index
    %c0_70 = arith.constant 0 : index
    %93 = vector.load %arg17[%c0_68, %c0_69, %c0_70] : memref<1x32x1xf32, #tpu.memory_space<vmem>>, vector<1x32x1xf32>
    %94 = vector.shape_cast %93 : vector<1x32x1xf32> to vector<32x1xf32>
    %95 = vector.broadcast %94 : vector<32x1xf32> to vector<32x512xf32>
    %96 = arith.mulf %92, %95 : vector<32x512xf32>
    %cst_71 = arith.constant dense<0.000000e+00> : vector<512xf32>
    %97 = vector.multi_reduction <add>, %96, %cst_71 [0] : vector<32x512xf32> to vector<512xf32>
    %98 = vector.shape_cast %97 : vector<512xf32> to vector<1x512xf32>
    %c0_72 = arith.constant 0 : index
    %c0_73 = arith.constant 0 : index
    %c0_74 = arith.constant 0 : index
    %99 = vector.load %arg18[%c0_72, %c0_73, %c0_74] : memref<1x1x1xf32, #tpu.memory_space<vmem>>, vector<1x1x1xf32>
    %100 = vector.shape_cast %99 : vector<1x1x1xf32> to vector<1x1xf32>
    %101 = vector.broadcast %100 : vector<1x1xf32> to vector<1x512xf32>
    %102 = arith.addf %98, %101 : vector<1x512xf32>
    %c0_75 = arith.constant 0 : index
    %c0_76 = arith.constant 0 : index
    %103 = vector.load %arg4[%c0_75, %c0_76] : memref<1x512xf32, #tpu.memory_space<vmem>>, vector<1x512xf32>
    %104 = arith.mulf %102, %103 : vector<1x512xf32>
    %c0_77 = arith.constant 0 : index
    %c0_78 = arith.constant 0 : index
    %105 = vector.load %arg6[%c0_77, %c0_78] : memref<512x8xf32, #tpu.memory_space<vmem>>, vector<512x8xf32>
    %cst_79 = arith.constant dense<0.000000e+00> : vector<1x8xf32>
    %106 = tpu.matmul %104, %105, %cst_79 {dimension_numbers = #tpu.dot_dimension_numbers<[1], [0], [0], [1], [0, 0, 1, 1], [], []>} : vector<1x512xf32>, vector<512x8xf32>, vector<1x8xf32> -> vector<1x8xf32>
    %cst_80 = arith.constant 1.460000e-01 : f32
    %107 = vector.broadcast %cst_80 : f32 to vector<1x8xf32>
    %108 = arith.mulf %107, %106 : vector<1x8xf32>
    %109 = vector.broadcast %1 : f32 to vector<1x8xf32>
    %110 = arith.mulf %50, %109 : vector<1x8xf32>
    %111 = tpu.iota {dimensions = array<i32: 0>} : vector<2x1xi32>
    %c0_i32 = arith.constant 0 : i32
    %112 = vector.broadcast %c0_i32 : i32 to vector<2x1xi32>
    %113 = arith.cmpi eq, %111, %112 : vector<2x1xi32>
    %114 = math.cos %110 : vector<1x8xf32>
    %115 = math.sin %110 : vector<1x8xf32>
    %116 = vector.shape_cast %113 : vector<2x1xi1> to vector<2x1xi1>
    %117 = vector.broadcast %116 : vector<2x1xi1> to vector<2x8xi1>
    %118 = vector.shape_cast %114 : vector<1x8xf32> to vector<1x8xf32>
    %119 = vector.broadcast %118 : vector<1x8xf32> to vector<2x8xf32>
    %120 = vector.shape_cast %115 : vector<1x8xf32> to vector<1x8xf32>
    %121 = vector.broadcast %120 : vector<1x8xf32> to vector<2x8xf32>
    %122 = arith.select %117, %119, %121 : vector<2x8xi1>, vector<2x8xf32>
    %cst_81 = arith.constant 1.000000e+00 : f32
    %123 = vector.broadcast %cst_81 : f32 to vector<1x8xf32>
    %124 = arith.mulf %123, %108 : vector<1x8xf32>
    %125 = vector.broadcast %124 : vector<1x8xf32> to vector<2x8xf32>
    %126 = arith.mulf %122, %125 : vector<2x8xf32>
    %cst_82 = arith.constant dense<0.000000e+00> : vector<2x512xf32>
    %127 = tpu.matmul %126, %51, %cst_82 {dimension_numbers = #tpu.dot_dimension_numbers<[1], [0], [0], [1], [0, 0, 1, 1], [], []>} : vector<2x8xf32>, vector<8x512xf32>, vector<2x512xf32> -> vector<2x512xf32>
    %128 = vector.broadcast %102 : vector<1x512xf32> to vector<2x512xf32>
    %129 = arith.mulf %127, %128 : vector<2x512xf32>
    %130 = vector.extract_strided_slice %129 {offsets = [0, 0], sizes = [2, 64], strides = [1, 1]} : vector<2x512xf32> to vector<2x64xf32>
    %c0_83 = arith.constant 0 : index
    %c0_84 = arith.constant 0 : index
    %c0_85 = arith.constant 0 : index
    %131 = vector.load %arg20[%c0_83, %c0_84, %c0_85] : memref<2x8x64xf32, #tpu.memory_space<vmem>>, vector<2x1x64xf32>
    %132 = vector.shape_cast %131 : vector<2x1x64xf32> to vector<2x64xf32>
    %133 = vector.shape_cast %130 : vector<2x64xf32> to vector<2x1x64xf32>
    tpu.vector_store %arg20[%c0_83, %c0_84, %c0_85], %133 {strides = array<i32>} : memref<2x8x64xf32, #tpu.memory_space<vmem>>, vector<2x1x64xf32>,
    %134 = vector.extract_strided_slice %129 {offsets = [0, 64], sizes = [2, 64], strides = [1, 1]} : vector<2x512xf32> to vector<2x64xf32>
    %c0_86 = arith.constant 0 : index
    %c1_87 = arith.constant 1 : index
    %c0_88 = arith.constant 0 : index
    %135 = vector.load %arg20[%c0_86, %c1_87, %c0_88] : memref<2x8x64xf32, #tpu.memory_space<vmem>>, vector<2x1x64xf32>
    %136 = vector.shape_cast %135 : vector<2x1x64xf32> to vector<2x64xf32>
    %137 = vector.shape_cast %134 : vector<2x64xf32> to vector<2x1x64xf32>
    tpu.vector_store %arg20[%c0_86, %c1_87, %c0_88], %137 {strides = array<i32>} : memref<2x8x64xf32, #tpu.memory_space<vmem>>, vector<2x1x64xf32>,
    %138 = vector.extract_strided_slice %129 {offsets = [0, 128], sizes = [2, 64], strides = [1, 1]} : vector<2x512xf32> to vector<2x64xf32>
    %c0_89 = arith.constant 0 : index
    %c2 = arith.constant 2 : index
    %c0_90 = arith.constant 0 : index
    %139 = vector.load %arg20[%c0_89, %c2, %c0_90] : memref<2x8x64xf32, #tpu.memory_space<vmem>>, vector<2x1x64xf32>
    %140 = vector.shape_cast %139 : vector<2x1x64xf32> to vector<2x64xf32>
    %141 = vector.shape_cast %138 : vector<2x64xf32> to vector<2x1x64xf32>
    tpu.vector_store %arg20[%c0_89, %c2, %c0_90], %141 {strides = array<i32>} : memref<2x8x64xf32, #tpu.memory_space<vmem>>, vector<2x1x64xf32>,
    %142 = vector.extract_strided_slice %129 {offsets = [0, 192], sizes = [2, 64], strides = [1, 1]} : vector<2x512xf32> to vector<2x64xf32>
    %c0_91 = arith.constant 0 : index
    %c3 = arith.constant 3 : index
    %c0_92 = arith.constant 0 : index
    %143 = vector.load %arg20[%c0_91, %c3, %c0_92] : memref<2x8x64xf32, #tpu.memory_space<vmem>>, vector<2x1x64xf32>
    %144 = vector.shape_cast %143 : vector<2x1x64xf32> to vector<2x64xf32>
    %145 = vector.shape_cast %142 : vector<2x64xf32> to vector<2x1x64xf32>
    tpu.vector_store %arg20[%c0_91, %c3, %c0_92], %145 {strides = array<i32>} : memref<2x8x64xf32, #tpu.memory_space<vmem>>, vector<2x1x64xf32>,
    %146 = vector.extract_strided_slice %129 {offsets = [0, 256], sizes = [2, 64], strides = [1, 1]} : vector<2x512xf32> to vector<2x64xf32>
    %c0_93 = arith.constant 0 : index
    %c4 = arith.constant 4 : index
    %c0_94 = arith.constant 0 : index
    %147 = vector.load %arg20[%c0_93, %c4, %c0_94] : memref<2x8x64xf32, #tpu.memory_space<vmem>>, vector<2x1x64xf32>
    %148 = vector.shape_cast %147 : vector<2x1x64xf32> to vector<2x64xf32>
    %149 = vector.shape_cast %146 : vector<2x64xf32> to vector<2x1x64xf32>
    tpu.vector_store %arg20[%c0_93, %c4, %c0_94], %149 {strides = array<i32>} : memref<2x8x64xf32, #tpu.memory_space<vmem>>, vector<2x1x64xf32>,
    %150 = vector.extract_strided_slice %129 {offsets = [0, 320], sizes = [2, 64], strides = [1, 1]} : vector<2x512xf32> to vector<2x64xf32>
    %c0_95 = arith.constant 0 : index
    %c5 = arith.constant 5 : index
    %c0_96 = arith.constant 0 : index
    %151 = vector.load %arg20[%c0_95, %c5, %c0_96] : memref<2x8x64xf32, #tpu.memory_space<vmem>>, vector<2x1x64xf32>
    %152 = vector.shape_cast %151 : vector<2x1x64xf32> to vector<2x64xf32>
    %153 = vector.shape_cast %150 : vector<2x64xf32> to vector<2x1x64xf32>
    tpu.vector_store %arg20[%c0_95, %c5, %c0_96], %153 {strides = array<i32>} : memref<2x8x64xf32, #tpu.memory_space<vmem>>, vector<2x1x64xf32>,
    %154 = vector.extract_strided_slice %129 {offsets = [0, 384], sizes = [2, 64], strides = [1, 1]} : vector<2x512xf32> to vector<2x64xf32>
    %c0_97 = arith.constant 0 : index
    %c6 = arith.constant 6 : index
    %c0_98 = arith.constant 0 : index
    %155 = vector.load %arg20[%c0_97, %c6, %c0_98] : memref<2x8x64xf32, #tpu.memory_space<vmem>>, vector<2x1x64xf32>
    %156 = vector.shape_cast %155 : vector<2x1x64xf32> to vector<2x64xf32>
    %157 = vector.shape_cast %154 : vector<2x64xf32> to vector<2x1x64xf32>
    tpu.vector_store %arg20[%c0_97, %c6, %c0_98], %157 {strides = array<i32>} : memref<2x8x64xf32, #tpu.memory_space<vmem>>, vector<2x1x64xf32>,
    %158 = vector.extract_strided_slice %129 {offsets = [0, 448], sizes = [2, 64], strides = [1, 1]} : vector<2x512xf32> to vector<2x64xf32>
    %c0_99 = arith.constant 0 : index
    %c7 = arith.constant 7 : index
    %c0_100 = arith.constant 0 : index
    %159 = vector.load %arg20[%c0_99, %c7, %c0_100] : memref<2x8x64xf32, #tpu.memory_space<vmem>>, vector<2x1x64xf32>
    %160 = vector.shape_cast %159 : vector<2x1x64xf32> to vector<2x64xf32>
    %161 = vector.shape_cast %158 : vector<2x64xf32> to vector<2x1x64xf32>
    tpu.vector_store %arg20[%c0_99, %c7, %c0_100], %161 {strides = array<i32>} : memref<2x8x64xf32, #tpu.memory_space<vmem>>, vector<2x1x64xf32>,
    %cst_101 = arith.constant 0.000000e+00 : f32
    %162 = vector.broadcast %cst_101 : f32 to vector<2x12x16xf32>
    %c0_102 = arith.constant 0 : index
    %c0_103 = arith.constant 0 : index
    %c0_104 = arith.constant 0 : index
    %c0_105 = arith.constant 0 : index
    %163 = vector.load %arg19[%c0_102, %c0_103, %c0_104, %c0_105] : memref<1x2x12x16xf32, #tpu.memory_space<vmem>>, vector<1x2x12x16xf32>
    %164 = vector.shape_cast %163 : vector<1x2x12x16xf32> to vector<2x12x16xf32>
    %165 = vector.shape_cast %162 : vector<2x12x16xf32> to vector<1x2x12x16xf32>
    tpu.vector_store %arg19[%c0_102, %c0_103, %c0_104, %c0_105], %165 {strides = array<i32>} : memref<1x2x12x16xf32, #tpu.memory_space<vmem>>, vector<1x2x12x16xf32>,
    %c0_106 = arith.constant 0 : index
    %c0_107 = arith.constant 0 : index
    %c0_108 = arith.constant 0 : index
    %c0_109 = arith.constant 0 : index
    %166 = vector.load %arg19[%c0_106, %c0_107, %c0_108, %c0_109] : memref<1x2x12x16xf32, #tpu.memory_space<vmem>>, vector<1x2x8x16xf32>
    %167 = vector.shape_cast %166 : vector<1x2x8x16xf32> to vector<2x8x16xf32>
    %c0_110 = arith.constant 0 : index
    %c0_111 = arith.constant 0 : index
    %c0_112 = arith.constant 0 : index
    %168 = vector.load %arg20[%c0_110, %c0_111, %c0_112] : memref<2x8x64xf32, #tpu.memory_space<vmem>>, vector<2x8x16xf32>
    %169 = arith.addf %167, %168 : vector<2x8x16xf32>
    %c0_113 = arith.constant 0 : index
    %c0_114 = arith.constant 0 : index
    %c0_115 = arith.constant 0 : index
    %c0_116 = arith.constant 0 : index
    %170 = vector.load %arg19[%c0_113, %c0_114, %c0_115, %c0_116] : memref<1x2x12x16xf32, #tpu.memory_space<vmem>>, vector<1x2x8x16xf32>
    %171 = vector.shape_cast %170 : vector<1x2x8x16xf32> to vector<2x8x16xf32>
    %172 = vector.shape_cast %169 : vector<2x8x16xf32> to vector<1x2x8x16xf32>
    tpu.vector_store %arg19[%c0_113, %c0_114, %c0_115, %c0_116], %172 {strides = array<i32>} : memref<1x2x12x16xf32, #tpu.memory_space<vmem>>, vector<1x2x8x16xf32>,
    %c0_117 = arith.constant 0 : index
    %c0_118 = arith.constant 0 : index
    %c1_119 = arith.constant 1 : index
    %c0_120 = arith.constant 0 : index
    %173 = vector.load %arg19[%c0_117, %c0_118, %c1_119, %c0_120] : memref<1x2x12x16xf32, #tpu.memory_space<vmem>>, vector<1x2x8x16xf32>
    %174 = vector.shape_cast %173 : vector<1x2x8x16xf32> to vector<2x8x16xf32>
    %c0_121 = arith.constant 0 : index
    %c0_122 = arith.constant 0 : index
    %c16 = arith.constant 16 : index
    %175 = vector.load %arg20[%c0_121, %c0_122, %c16] : memref<2x8x64xf32, #tpu.memory_space<vmem>>, vector<2x8x16xf32>
    %176 = arith.addf %174, %175 : vector<2x8x16xf32>
    %c0_123 = arith.constant 0 : index
    %c0_124 = arith.constant 0 : index
    %c1_125 = arith.constant 1 : index
    %c0_126 = arith.constant 0 : index
    %177 = vector.load %arg19[%c0_123, %c0_124, %c1_125, %c0_126] : memref<1x2x12x16xf32, #tpu.memory_space<vmem>>, vector<1x2x8x16xf32>
    %178 = vector.shape_cast %177 : vector<1x2x8x16xf32> to vector<2x8x16xf32>
    %179 = vector.shape_cast %176 : vector<2x8x16xf32> to vector<1x2x8x16xf32>
    tpu.vector_store %arg19[%c0_123, %c0_124, %c1_125, %c0_126], %179 {strides = array<i32>} : memref<1x2x12x16xf32, #tpu.memory_space<vmem>>, vector<1x2x8x16xf32>,
    %c0_127 = arith.constant 0 : index
    %c0_128 = arith.constant 0 : index
    %c2_129 = arith.constant 2 : index
    %c0_130 = arith.constant 0 : index
    %180 = vector.load %arg19[%c0_127, %c0_128, %c2_129, %c0_130] : memref<1x2x12x16xf32, #tpu.memory_space<vmem>>, vector<1x2x8x16xf32>
    %181 = vector.shape_cast %180 : vector<1x2x8x16xf32> to vector<2x8x16xf32>
    %c0_131 = arith.constant 0 : index
    %c0_132 = arith.constant 0 : index
    %c32 = arith.constant 32 : index
    %182 = vector.load %arg20[%c0_131, %c0_132, %c32] : memref<2x8x64xf32, #tpu.memory_space<vmem>>, vector<2x8x16xf32>
    %183 = arith.addf %181, %182 : vector<2x8x16xf32>
    %c0_133 = arith.constant 0 : index
    %c0_134 = arith.constant 0 : index
    %c2_135 = arith.constant 2 : index
    %c0_136 = arith.constant 0 : index
    %184 = vector.load %arg19[%c0_133, %c0_134, %c2_135, %c0_136] : memref<1x2x12x16xf32, #tpu.memory_space<vmem>>, vector<1x2x8x16xf32>
    %185 = vector.shape_cast %184 : vector<1x2x8x16xf32> to vector<2x8x16xf32>
    %186 = vector.shape_cast %183 : vector<2x8x16xf32> to vector<1x2x8x16xf32>
    tpu.vector_store %arg19[%c0_133, %c0_134, %c2_135, %c0_136], %186 {strides = array<i32>} : memref<1x2x12x16xf32, #tpu.memory_space<vmem>>, vector<1x2x8x16xf32>,
    %c0_137 = arith.constant 0 : index
    %c0_138 = arith.constant 0 : index
    %c3_139 = arith.constant 3 : index
    %c0_140 = arith.constant 0 : index
    %187 = vector.load %arg19[%c0_137, %c0_138, %c3_139, %c0_140] : memref<1x2x12x16xf32, #tpu.memory_space<vmem>>, vector<1x2x8x16xf32>
    %188 = vector.shape_cast %187 : vector<1x2x8x16xf32> to vector<2x8x16xf32>
    %c0_141 = arith.constant 0 : index
    %c0_142 = arith.constant 0 : index
    %c48 = arith.constant 48 : index
    %189 = vector.load %arg20[%c0_141, %c0_142, %c48] : memref<2x8x64xf32, #tpu.memory_space<vmem>>, vector<2x8x16xf32>
    %190 = arith.addf %188, %189 : vector<2x8x16xf32>
    %c0_143 = arith.constant 0 : index
    %c0_144 = arith.constant 0 : index
    %c3_145 = arith.constant 3 : index
    %c0_146 = arith.constant 0 : index
    %191 = vector.load %arg19[%c0_143, %c0_144, %c3_145, %c0_146] : memref<1x2x12x16xf32, #tpu.memory_space<vmem>>, vector<1x2x8x16xf32>
    %192 = vector.shape_cast %191 : vector<1x2x8x16xf32> to vector<2x8x16xf32>
    %193 = vector.shape_cast %190 : vector<2x8x16xf32> to vector<1x2x8x16xf32>
    tpu.vector_store %arg19[%c0_143, %c0_144, %c3_145, %c0_146], %193 {strides = array<i32>} : memref<1x2x12x16xf32, #tpu.memory_space<vmem>>, vector<1x2x8x16xf32>,
    return
  }
  func.func @transform_0(%arg0: i32) -> i32 {
    %c0_i32 = arith.constant 0 : i32
    %c0_i32_0 = arith.constant 0 : i32
    return %c0_i32 : i32
  }
  func.func @transform_1(%arg0: i32) -> (i32, i32) {
    %c0_i32 = arith.constant 0 : i32
    %c0_i32_0 = arith.constant 0 : i32
    %c0_i32_1 = arith.constant 0 : i32
    return %c0_i32, %c0_i32_0 : i32, i32
  }
  func.func @transform_2(%arg0: i32) -> (i32, i32) {
    %c0_i32 = arith.constant 0 : i32
    %c0_i32_0 = arith.constant 0 : i32
    %c0_i32_1 = arith.constant 0 : i32
    return %c0_i32, %c0_i32_0 : i32, i32
  }
  func.func @transform_3(%arg0: i32) -> (i32, i32) {
    %c0_i32 = arith.constant 0 : i32
    %c0_i32_0 = arith.constant 0 : i32
    %c0_i32_1 = arith.constant 0 : i32
    return %c0_i32, %c0_i32_0 : i32, i32
  }
  func.func @transform_4(%arg0: i32) -> (i32, i32) {
    %c0_i32 = arith.constant 0 : i32
    %c0_i32_0 = arith.constant 0 : i32
    %c0_i32_1 = arith.constant 0 : i32
    return %c0_i32, %c0_i32_0 : i32, i32
  }
  func.func @transform_5(%arg0: i32) -> (i32, i32) {
    %c0_i32 = arith.constant 0 : i32
    %c0_i32_0 = arith.constant 0 : i32
    %c0_i32_1 = arith.constant 0 : i32
    return %c0_i32, %c0_i32_0 : i32, i32
  }
  func.func @transform_6(%arg0: i32) -> (i32, i32, i32) {
    %c0_i32 = arith.constant 0 : i32
    %c0_i32_0 = arith.constant 0 : i32
    %c0_i32_1 = arith.constant 0 : i32
    return %arg0, %c0_i32, %c0_i32_0 : i32, i32, i32
  }
  func.func @transform_7(%arg0: i32) -> (i32, i32, i32) {
    %c0_i32 = arith.constant 0 : i32
    %c0_i32_0 = arith.constant 0 : i32
    %c0_i32_1 = arith.constant 0 : i32
    return %arg0, %c0_i32, %c0_i32_0 : i32, i32, i32
  }
  func.func @transform_8(%arg0: i32) -> (i32, i32, i32, i32) {
    %c0_i32 = arith.constant 0 : i32
    %c0_i32_0 = arith.constant 0 : i32
    %c0_i32_1 = arith.constant 0 : i32
    %c0_i32_2 = arith.constant 0 : i32
    return %arg0, %c0_i32, %c0_i32_0, %c0_i32_1 : i32, i32, i32, i32
  }
  func.func @transform_9(%arg0: i32) -> (i32, i32, i32, i32) {
    %c0_i32 = arith.constant 0 : i32
    %c0_i32_0 = arith.constant 0 : i32
    %c0_i32_1 = arith.constant 0 : i32
    %c0_i32_2 = arith.constant 0 : i32
    return %arg0, %c0_i32, %c0_i32_0, %c0_i32_1 : i32, i32, i32, i32
  }
  func.func @transform_10(%arg0: i32) -> (i32, i32, i32) {
    %c0_i32 = arith.constant 0 : i32
    %c0_i32_0 = arith.constant 0 : i32
    %c0_i32_1 = arith.constant 0 : i32
    return %arg0, %c0_i32, %c0_i32_0 : i32, i32, i32
  }
  func.func @transform_11(%arg0: i32) -> (i32, i32, i32) {
    %c0_i32 = arith.constant 0 : i32
    %c0_i32_0 = arith.constant 0 : i32
    %c0_i32_1 = arith.constant 0 : i32
    return %arg0, %c0_i32, %c0_i32_0 : i32, i32, i32
  }
  func.func @transform_12(%arg0: i32) -> (i32, i32, i32) {
    %c0_i32 = arith.constant 0 : i32
    %c0_i32_0 = arith.constant 0 : i32
    %c0_i32_1 = arith.constant 0 : i32
    return %arg0, %c0_i32, %c0_i32_0 : i32, i32, i32
  }
  func.func @transform_13(%arg0: i32) -> (i32, i32, i32) {
    %c0_i32 = arith.constant 0 : i32
    %c0_i32_0 = arith.constant 0 : i32
    %c0_i32_1 = arith.constant 0 : i32
    return %arg0, %c0_i32, %c0_i32_0 : i32, i32, i32
  }
  func.func @transform_14(%arg0: i32) -> (i32, i32, i32, i32) {
    %c0_i32 = arith.constant 0 : i32
    %c0_i32_0 = arith.constant 0 : i32
    %c0_i32_1 = arith.constant 0 : i32
    %c0_i32_2 = arith.constant 0 : i32
    return %arg0, %c0_i32, %c0_i32_0, %c0_i32_1 : i32, i32, i32, i32
  }
  func.func @transform_15(%arg0: i32) -> (i32, i32, i32, i32) {
    %c0_i32 = arith.constant 0 : i32
    %c0_i32_0 = arith.constant 0 : i32
    %c0_i32_1 = arith.constant 0 : i32
    %c0_i32_2 = arith.constant 0 : i32
    return %arg0, %c0_i32, %c0_i32_0, %c0_i32_1 : i32, i32, i32, i32
  }
  func.func @transform_16(%arg0: i32) -> (i32, i32, i32) {
    %c0_i32 = arith.constant 0 : i32
    %c0_i32_0 = arith.constant 0 : i32
    %c0_i32_1 = arith.constant 0 : i32
    return %arg0, %c0_i32, %c0_i32_0 : i32, i32, i32
  }
  func.func @transform_17(%arg0: i32) -> (i32, i32, i32) {
    %c0_i32 = arith.constant 0 : i32
    %c0_i32_0 = arith.constant 0 : i32
    %c0_i32_1 = arith.constant 0 : i32
    return %arg0, %c0_i32, %c0_i32_0 : i32, i32, i32
  }
  func.func @transform_18(%arg0: i32) -> (i32, i32, i32, i32) {
    %c0_i32 = arith.constant 0 : i32
    %c0_i32_0 = arith.constant 0 : i32
    %c0_i32_1 = arith.constant 0 : i32
    %c0_i32_2 = arith.constant 0 : i32
    return %arg0, %c0_i32, %c0_i32_0, %c0_i32_1 : i32, i32, i32, i32
  }
}

</mosaic_0001>

<bundles_post_ra>
// kernel: tpu_custom_call.1
= control target key start
LH: loop header
LB: loop body
LE: loop exit
PB: predicated region body
PF: predicated region fallthrough
CT: control target
= control target key end

     0   :  { %s4107_s0 = inlined_call_operand.vmem [shape: f32[2], index: 0, kind: input, shape index: {}]   ;;  %s4108_s1 = inlined_call_operand.vmem [shape: f32[1,8], index: 1, kind: input, shape index: {}]   ;;  %s4109_s2 = inlined_call_operand.vmem [shape: f32[1,512], index: 2, kind: input, shape index: {}]   ;;  %s4110_s3 = inlined_call_operand.vmem [shape: f32[1,512], index: 3, kind: input, shape index: {}]   ;;  %s4111_s4 = inlined_call_operand.vmem [shape: f32[8,512], index: 4, kind: input, shape index: {}]   ;;  %s4112_s5 = inlined_call_operand.vmem [shape: f32[512,8], index: 5, kind: input, shape index: {}]   ;;  %s4113_s6 = inlined_call_operand.vmem [shape: f32[2,32,1], index: 6, kind: input, shape index: {}]   ;;  %s4114_s7 = inlined_call_operand.vmem [shape: f32[2,32,1], index: 7, kind: input, shape index: {}]   ;;  %s4115_s8 = inlined_call_operand.vmem [shape: f32[2,2,32,32], index: 8, kind: input, shape index: {}]   ;;  %s4116_s9 = inlined_call_operand.vmem [shape: f32[2,2,32,1], index: 9, kind: input, shape index: {}]   ;;  %s4117_s10 = inlined_call_operand.vmem [shape: f32[2,32,1], index: 10, kind: input, shape index: {}]   ;;  %s4118_s11 = inlined_call_operand.vmem [shape: f32[2,1,1], index: 11, kind: input, shape index: {}]   ;;  %s4119_s12 = inlined_call_operand.vmem [shape: f32[2,32,2], index: 12, kind: input, shape index: {}]   ;;  %s4120_s13 = inlined_call_operand.vmem [shape: f32[2,32,1], index: 13, kind: input, shape index: {}]   ;;  %s4121_s14 = inlined_call_operand.vmem [shape: f32[2,2,32,32], index: 14, kind: input, shape index: {}]   ;;  %s4122_s15 = inlined_call_operand.vmem [shape: f32[2,2,32,1], index: 15, kind: input, shape index: {}]   ;;  %s4123_s16 = inlined_call_operand.vmem [shape: f32[2,32,1], index: 16, kind: input, shape index: {}]   ;;  %s4124_s17 = inlined_call_operand.vmem [shape: f32[2,1,1], index: 17, kind: input, shape index: {}]   ;;  %s4125_s18 = inlined_call_operand.vmem [shape: f32[2,2,12,16], index: 18, kind: output, shape index: {}]  }
   0x1   :  { %4126 = sst [smem:[#allocation6_spill]] %s4107_s0 }
   0x2   :  { %4127 = sst [smem:[#allocation7_spill]] %s4108_s1 }
   0x3   :  { %4128 = sst [smem:[#allocation8_spill]] %s4109_s2 }
   0x4   :  { %23 = vsyncpa [#allocation4], 0  ;;  %s3366_s27 = smov 0  }
   0x5 LB: > { %s3372_s28 = sadd.s32 4294967295, %s3254_s27   ;;  %p2973_p0 = scmp.ge.s32.totalorder %s3254_s27, 1  ;;  %s3254_s27 = sphi %s3366_s27, %s29_s27  }
   0x6   : > { %p498_p1 = scmp.lt.s32.totalorder %s3254_s27, 3  ;;  %s4129_s0 = sld [smem:[#allocation6_spill]] }
   0x7   : > { %p3184_p3 = scmp.eq.s32.totalorder %s3372_s28, 0 }
   0x8   : > { %p3379_p2 = pnand %p2973_p0, %p498_p1 }
   0xa   : > { %p3180_p4 = pneg %p3379_p2 }
   0xc   : > { %s511_s19 = sshll.u32 %s4129_s0, 4  ;;  %p3181_p5 = pnand %p3184_p3, %p3180_p4  ;;  %s512_s19 = int_to_ptr.vmem [resolvable:$true] %s511_s19 }
   0xd   : > { %s3229_s20 = scalar_lea.vmem %s512_s19, 16  ;;  %p3237_p10 = scmp.lt.s32.totalorder %s512_s19, %s512_s19 }
   0xe   : > { %p3230_p6 = scmp.ne.s32.totalorder %s512_s19, %s3229_s20  ;;  %p3231_p7 = pneg %p3181_p5 }
   0xf   : > { %p3238_p11 = scmp.lt.s32.totalorder %s3229_s20, %s3229_s20 }
  0x10   : > { %p3232_p8 = pnand %p3231_p7, %p3230_p6 }
  0x11   : > { %p3239_p12 = por %p3238_p11, %p3237_p10 }
  0x12   : > { %p3233_p9 = pneg %p3232_p8 }
  0x14   : > { %p3240_p13 = pnand %p3239_p12, %p3233_p9 }
  0x16   : > { %3243 = shalt.err (!%p3240_p13)
}
  0x17   : > { %s3256_s21 = smov [#allocation3]   ;;  %631 = sbr.rel (%p3379_p2) target bundleno = 1750 (0x6d6), region = 92 }
  0x18   : > { %3183 = dma.vmem_to_smem (!%p3181_p5), %s512_s19, 16, %s3256_s21, [#allocation4]  }
  0x1c   : > { %3249 = dma.done.wait (%p3184_p3), [#allocation4], 16  }
  0x1d   : > { %3251 = vsyncadd (%p3184_p3), [#allocation4], 4294967280 }
  0x1e   : > { %637 = sfence }
  0x1f   : > { %p737_p0 = scmp.lt.s32.totalorder %s3372_s28, 1  ;;  %v3257_v0 = vmov 0   ;;  %vm903_vm0 = vcmask 261120   ;;  %v3258_v16 = vmov 1   ;;  %v834_v27 = vlaneseq  ;;  %v1190_v56 = vld [vmem:[%s4111_s4 + $0x8] sm:$0xff]  ;;  %v1189_v59 = vld [vmem:[%s4111_s4] sm:$0xff] }
  0x20   : > { %3210 = vset.pattern.permute.xlu1 %v3257_v0  ;;  %3209 = vset.pattern.permute.xlu0 %v3257_v0  ;;  %s4132_s23 = sld [smem:[#allocation8_spill]]  ;;  %vm1164_vm1 = vcmask 64512  }
  0x21   : > { %s3398_s22 = scalar_select %p737_p0, %s3372_s28, 1  ;;  %v3446_v30 = vshrl.u32 %v834_v27, 7 }
  0x23   : > { %s3401_s2 = sshll.u32 %s3398_s22, 5  ;;  %s3412_s0 = sshll.u32 %s3398_s22, 6  ;;  %v3451_v32 = vsub.s32 0, %v3446_v30  ;;  %v1421_v60 = vsub.s32 2, %v3446_v30  ;;  %v1425_v61 = vsub.s32 3, %v3446_v30  ;;  %vm2178_vm11 = vcmp.eq.s32.totalorder %v3446_v30, 0 }
  0x24   : > { %s746_s25 = scalar_lea.vmem %s4114_s7, %s3401_s2  ;;  %s741_s30 = scalar_lea.vmem %s4113_s6, %s3401_s2 }
  0x25   : > { %v846_v1 = vld [vmem:[%s746_s25 + $0x18] sm:$0xff]  ;;  %v810_v3 = vld [vmem:[%s741_s30 + $0x8] sm:$0xff]  ;;  %v811_v4 = vld [vmem:[%s741_s30 + $0x10] sm:$0xff]  ;;  %s3418_s20 = scalar_lea.vmem %s4116_s9, %s3412_s0  ;;  %s3426_s24 = scalar_lea.vmem %s4115_s8, %s3412_s0 }
  0x26   : > { %864 = vperm.xlu1 %3210, %v846_v1   ;;  %v812_v2 = vld [vmem:[%s741_s30 + $0x18] sm:$0xff]  ;;  %v809_v5 = vld [vmem:[%s741_s30] sm:$0xff]  ;;  %v845_v6 = vld [vmem:[%s746_s25 + $0x10] sm:$0xff]  ;;  %s769_s29 = scalar_lea.vmem %s4119_s12, %s3401_s2  ;;  %s774_s1 = scalar_lea.vmem %s4120_s13, %s3401_s2 }
  0x27   : > { %830 = vperm.xlu0 %3209, %v812_v2   ;;  %v843_v7 = vld [vmem:[%s746_s25] sm:$0xff]  ;;  %v844_v8 = vld [vmem:[%s746_s25 + $0x8] sm:$0xff]  ;;  %v881_v9 = vld [vmem:[%s3418_s20 + $0x10] sm:$0xff]  ;;  %s4131_s25 = sld [smem:[#allocation7_spill]]  ;;  %s761_s30 = scalar_lea.vmem %s4117_s10, %s3401_s2 }
  0x28   : > { %v882_v10 = vld [vmem:[%s3418_s20 + $0x18] sm:$0xff]  ;;  %v875_v11 = vld [vmem:[%s3426_s24] sm:$0xff]  ;;  %v880_v13 = vld [vmem:[%s3418_s20 + $0x8] sm:$0xff]  ;;  %s764_s21 = scalar_lea.vmem %s4118_s11, %s3398_s22 }
  0x29   : > { %3152 = vmatprep.mubr.msk.f32.mxu0 %vm903_vm0, %v875_v11  ;;  %v879_v12 = vld [vmem:[%s3418_s20] sm:$0xff]  ;;  %v1341_v14 = vld [vmem:[%s769_s29 + $0x18] sm:$0xff]  ;;  %v1340_v15 = vld [vmem:[%s769_s29 + $0x10] sm:$0xff] }
  0x2a   : > { %820 = vperm.xlu1 %3210, %v810_v3   ;;  %v1338_v17 = vld [vmem:[%s769_s29] sm:$0xff]  ;;  %v1339_v18 = vld [vmem:[%s769_s29 + $0x8] sm:$0xff]  ;;  %v1465_v19 = vld [vmem:[%s774_s1 + $0x10] sm:$0xff]  ;;  %s784_s29 = scalar_lea.vmem %s4122_s15, %s3412_s0 }
  0x2b   : > { %825 = vperm.xlu0 %3209, %v811_v4   ;;  %v1463_v20 = vld [vmem:[%s774_s1] sm:$0xff]  ;;  %v1466_v21 = vld [vmem:[%s774_s1 + $0x18] sm:$0xff]  ;;  %v1464_v22 = vld [vmem:[%s774_s1 + $0x8] sm:$0xff]  ;;  %v3259_v4 = vmov 0.0   ;;  %s789_s1 = scalar_lea.vmem %s4123_s16, %s3401_s2 }
  0x2c   : > { %v876_v55 = vld [vmem:[%s3426_s24 + $0x8] sm:$0xff]  ;;  %v877_v58 = vld [vmem:[%s3426_s24 + $0x10] sm:$0xff]  ;;  %v878_v62 = vld [vmem:[%s3426_s24 + $0x18] sm:$0xff] }
  0x2d   : > { %v800_v23 = vld [vmem:[%s4131_s25] sm:$0x1]  ;;  %v3029_v27 = vld [vmem:[%s784_s29 + $0x30] sm:$0xff]  ;;  %s792_s25 = scalar_lea.vmem %s4124_s17, %s3398_s22 }
  0x2e   : > { %815 = vperm.xlu1 %3210, %v809_v5   ;;  %v3000_v24 = vmul.f32 -1.442695, %v800_v23  ;;  %v3477_v1 = vld [vmem:[%s4132_s23] sm:$0xf] }
  0x2f   : > { %859 = vperm.xlu0 %3209, %v845_v6   ;;  %v1422_v2 = vrot.slane %v3477_v1, %v1421_v60  ;;  %v1426_v3 = vrot.slane %v3477_v1, %v1425_v61  ;;  %v1533_v23 = vld [vmem:[%s784_s29] sm:$0xff] }
  0x30   : > { %3217 = vpow2.f32 %v3000_v24  ;;  %v1534_v24 = vld [vmem:[%s784_s29 + $0x8] sm:$0xff] }
  0x32   : > { %849 = vperm.xlu1 %3210, %v843_v7  }
  0x33   : > { %854 = vperm.xlu0 %3209, %v844_v8  }
  0x36   : > { %895 = vperm.xlu1 %3210, %v881_v9  }
  0x37   : > { %900 = vperm.xlu0 %3209, %v882_v10  }
  0x3a   : > { %885 = vperm.xlu1 %3210, %v879_v12  }
  0x3b   : > { %890 = vperm.xlu0 %3209, %v880_v13  }
  0x3d   : > { %v3218_v25 = vpop.eup %3217 }
  0x3e   : > { %1359 = vperm.xlu1 %3210, %v1341_v14   ;;  %v804_v26 = vadd.f32 1.0, %v3218_v25  ;;  %v3027_v25 = vld [vmem:[%s784_s29 + $0x20] sm:$0xff] }
  0x3f   : > { %3211 = vset.pattern.permute.xlu0 %v3258_v16 }
  0x40   : > { %1403 = vperm.xlu0 %3211, %v1340_v15   ;;  %3219 = vrcp.f32 %v804_v26  ;;  %v3028_v26 = vld [vmem:[%s784_s29 + $0x28] sm:$0xff] }
  0x42   : > { %3213 = vset.pattern.permute.xlu1 %v3258_v16 }
  0x43   : > { %1407 = vperm.xlu1 %3213, %v1341_v14  }
  0x44   : > { %3212 = vset.pattern.permute.xlu0 %v3257_v0 }
  0x45   : > { %1354 = vperm.xlu0 %3212, %v1340_v15  }
  0x47   : > { %3214 = vset.pattern.permute.xlu1 %v3257_v0 }
  0x48   : > { %1344 = vperm.xlu1 %3214, %v1338_v17  }
  0x49   : > { %1349 = vperm.xlu0 %3212, %v1339_v18  }
  0x4c   : > { %3215 = vset.pattern.permute.xlu1 %v3258_v16 }
  0x4d   : > { %1395 = vperm.xlu1 %3215, %v1338_v17   ;;  %1479 = vperm.xlu0 %3212, %v1465_v19   ;;  %v3220_v28 = vpop.eup %3219 }
  0x4e   : > { %v807_v29 = vmul.f32 0.18, %v3220_v28  ;;  %v3030_v28 = vld [vmem:[%s784_s29 + $0x38] sm:$0xff] }
  0x50   : > { %v3448_v31 = vadd.f32 0.12, %v807_v29  ;;  %v1853_v29 = vld [vmem:[%s789_s1] sm:$0xff] }
  0x51   : > { %1399 = vperm.xlu1 %3215, %v1339_v18   ;;  %1469 = vperm.xlu0 %3212, %v1463_v20   ;;  %v3005_v20 = vld [vmem:[%s3426_s24 + $0x20] sm:$0xff] }
  0x52   : > { %v837_v33 = vrot.slane %v3448_v31, %v3451_v32  ;;  %3166 = vmatprep.mubr.msk.f32.mxu1 %vm903_vm0, %v3005_v20 }
  0x55   : > { %3216 = vset.pattern.permute.xlu1 %v3257_v0 }
  0x56   : > { %1484 = vperm.xlu1 %3216, %v1466_v21   ;;  %v1535_v21 = vld [vmem:[%s784_s29 + $0x10] sm:$0xff] }
  0x57   : > { %1549 = vperm.xlu0 %3212, %v1535_v21  }
  0x5a   : > { %1474 = vperm.xlu1 %3216, %v1464_v22   ;;  %v1536_v22 = vld [vmem:[%s784_s29 + $0x18] sm:$0xff] }
  0x5b   : > { %1539 = vperm.xlu0 %3212, %v1533_v23  }
  0x5e   : > { %1554 = vperm.xlu1 %3216, %v1536_v22  }
  0x5f   : > { %1707 = vperm.xlu0 %3212, %v3027_v25  }
  0x62   : > { %1544 = vperm.xlu1 %3216, %v1534_v24  }
  0x63   : > { %1717 = vperm.xlu0 %3212, %v3029_v27  }
  0x66   : > { %1712 = vperm.xlu1 %3216, %v3028_v26  }
  0x67   : > { %1859 = vperm.xlu0 %3212, %v1853_v29  }
  0x6a   : > { %1722 = vperm.xlu1 %3216, %v3030_v28  }
  0xa1   : > { %v865_v34 = vpop.permute.xlu1 %864 }
  0xa2   : > { %v831_v35 = vpop.permute.xlu0 %830 }
  0xa3   : > { %v842_v36 = vmul.f32 %v837_v33, %v831_v35  ;;  %v1856_v35 = vld [vmem:[%s789_s1 + $0x18] sm:$0xff] }
  0xa5   : > { %v821_v37 = vpop.permute.xlu1 %820  ;;  %v870_v38 = vadd.f32 %v865_v34, %v842_v36  ;;  %v1855_v34 = vld [vmem:[%s789_s1 + $0x10] sm:$0xff]  ;;  %v1929_v36 = vld [vmem:[%s792_s25] sm:$0x1]  ;;  %s3267_s25 = smov 64  }
  0xa6   : > { %v826_v39 = vpop.permute.xlu0 %825  ;;  %v840_v45 = vmul.f32 %v837_v33, %v821_v37  ;;  %1869 = vperm.xlu0 %3212, %v1855_v34   ;;  %v3009_v37 = vld [vmem:[%s3418_s20 + $0x20] sm:$0xff] }
  0xa7   : > { %v874_v40 = vmax.f32 %v870_v38, 0.0  ;;  %v841_v41 = vmul.f32 %v837_v33, %v826_v39  ;;  %v3010_v38 = vld [vmem:[%s3418_s20 + $0x28] sm:$0xff]  ;;  %v3011_v39 = vld [vmem:[%s3418_s20 + $0x30] sm:$0xff] }
  0xa9   : > { %3144 = vmatprep.subr.mxu0 %v874_v40  ;;  %v816_v42 = vpop.permute.xlu1 %815 }
  0xaa   : > { %3145 = vmatpush3.msra.mxu0 %v874_v40  ;;  %v860_v43 = vpop.permute.xlu0 %859  ;;  %v839_v47 = vmul.f32 %v837_v33, %v816_v42  ;;  %v1854_v33 = vld [vmem:[%s789_s1 + $0x8] sm:$0xff]  ;;  %1932 = vperm.xlu0 %3212, %v1929_v36   ;;  %v3012_v40 = vld [vmem:[%s3418_s20 + $0x38] sm:$0xff] }
  0xab   : > { %v869_v44 = vadd.f32 %v860_v43, %v841_v41  ;;  %1864 = vperm.xlu1 %3216, %v1854_v33   ;;  %v1136_v41 = vld [vmem:[%s761_s30] sm:$0xff]  ;;  %v1137_v42 = vld [vmem:[%s761_s30 + $0x8] sm:$0xff]  ;;  %v1138_v43 = vld [vmem:[%s761_s30 + $0x10] sm:$0xff] }
  0xad   : > { %v873_v46 = vmax.f32 %v869_v44, 0.0  ;;  %v850_v48 = vpop.permute.xlu1 %849  ;;  %v1139_v44 = vld [vmem:[%s761_s30 + $0x18] sm:$0xff]  ;;  %s3618_s30 = scalar_lea.vmem %s4121_s14, %s3412_s0  ;;  %s3695_s0 = sld [smem:[#allocation3 + %s3372_s28]] }
  0xae   : > { %v855_v49 = vpop.permute.xlu0 %854  ;;  %v867_v51 = vadd.f32 %v850_v48, %v839_v47  ;;  %1022 = vperm.xlu0 %3212, %v3010_v38   ;;  %v1417_v48 = vsub.s32 1, %v3446_v30  ;;  %s3270_s28 = smov 80  }
  0xaf   : > { %v868_v50 = vadd.f32 %v855_v49, %v840_v45  ;;  %3146 = vmatprep.subr.mxu0 %v873_v46  ;;  %1874 = vperm.xlu1 %3216, %v1856_v35   ;;  %v1178_v45 = vld [vmem:[%s764_s21] sm:$0x1] }
  0xb0   : > { %3147 = vmatpush3.msra.mxu0 %v873_v46  ;;  %v871_v54 = vmax.f32 %v867_v51, 0.0  ;;  %v1414_v51 = vrot.slane %v3477_v1, %v3451_v32 }
  0xb1   : > { %v872_v52 = vmax.f32 %v868_v50, 0.0  ;;  %v3455_v53 = vpop.permute.xlu1 %895 }
  0xb2   : > { %v3498_v8 = vpop.permute.xlu0 %900  ;;  %1032 = vperm.xlu0 %3212, %v3012_v40  }
  0xb3   : > { %3148 = vmatprep.subr.mxu0 %v872_v52  ;;  %1017 = vperm.xlu1 %3216, %v3009_v37  }
  0xb4   : > { %3149 = vmatpush3.msra.mxu0 %v872_v52 }
  0xb5   : > { %3150 = vmatprep.subr.mxu0 %v871_v54  ;;  %v3461_v57 = vpop.permute.xlu1 %885 }
  0xb6   : > { %3151 = vmatpush3.msra.mxu0 %v871_v54  ;;  %v3500_v9 = vpop.permute.xlu0 %890  ;;  %1147 = vperm.xlu0 %3212, %v1137_v42  }
  0xb7   : > { %3153 = vmatmul.mubr.msk.f32.vlgmr.msra.gmra.mxu0 %vm903_vm0, %v876_v55  ;;  %1225 = vmatprep.subr.mxu0 %v1190_v56  ;;  %v1418_v55 = vrot.slane %v3477_v1, %v1417_v48 }
  0xb8   : > { %3155 = vmatprep.mubr.msk.f32.mxu0 %vm903_vm0, %v877_v58  ;;  %1226 = vmatpush1.msra.mxu0 %v1189_v59 }
  0xb9   : > { %v3472_v63 = vpop.permute.xlu1 %1359  ;;  %1027 = vperm.xlu1 %3216, %v3011_v39  }
  0xba   : > { %1157 = vperm.xlu0 %3212, %v1139_v44  }
  0xbb   : > { %3156 = vmatmul.mubr.msk.f32.gmra.mxu0 %vm903_vm0, %v878_v62  ;;  %v3502_v10 = vpop.permute.xlu0 %1403 }
  0xbc   : > { %1259 = vmatprep.mubr.f32.mxu0 %v3259_v4  ;;  %v3507_v12 = vmul.f32 %v1422_v2, %v3502_v10  ;;  %v3510_v13 = vmul.f32 %v1426_v3, %v3502_v10  ;;  %v1440_v25 = vmul.f32 %v1418_v55, %v3502_v10 }
  0xbd   : > { %1142 = vperm.xlu1 %3216, %v1136_v41  }
  0xbe   : > { %v3487_v5 = vpop.permute.xlu1 %1407 }
  0xbf   : > { %3017 = vmatmul.mubr.msk.f32.vlgmr.msra.gmra.mxu0 %vm1164_vm1, %v3448_v31  ;;  %v3492_v6 = vmul.f32 %v1422_v2, %v3487_v5  ;;  %v3495_v7 = vmul.f32 %v1426_v3, %v3487_v5  ;;  %v1444_v24 = vmul.f32 %v1418_v55, %v3487_v5 }
  0xc0   : > { %1595 = vmatprep.mubr.bf16.mxu0 %v3257_v0  ;;  %v3554_v46 = vpop.permute.xlu0 %1354 }
  0xc1   : > { %1152 = vperm.xlu1 %3216, %v1138_v43  }
  0xc3   : > { %v3504_v11 = vpop.permute.xlu1 %1344 }
  0xc4   : > { %v3557_v50 = vpop.permute.xlu0 %1349 }
  0xc5   : > { %1181 = vperm.xlu1 %3216, %v1178_v45   ;;  %v1192_v45 = vld [vmem:[%s4111_s4 + $0x18] sm:$0xff] }
  0xc8   : > { %v3512_v14 = vpop.permute.xlu1 %1395 }
  0xc9   : > { %v3515_v15 = vmul.f32 %v1422_v2, %v3512_v14  ;;  %v3518_v16 = vmul.f32 %v1426_v3, %v3512_v14 }
  0xcc   : > { %v3520_v17 = vpop.permute.xlu1 %1399 }
  0xcd   : > { %v3523_v18 = vmul.f32 %v1422_v2, %v3520_v17  ;;  %v3526_v19 = vmul.f32 %v1426_v3, %v3520_v17  ;;  %v1443_v2 = vmul.f32 %v1414_v51, %v3487_v5  ;;  %v1439_v3 = vmul.f32 %v1414_v51, %v3502_v10 }
  0xce   : > { %v1435_v1 = vmul.f32 %v1414_v51, %v3520_v17  ;;  %v1432_v5 = vmul.f32 %v1418_v55, %v3512_v14  ;;  %v1436_v10 = vmul.f32 %v1418_v55, %v3520_v17 }
  0xd1   : > { %v3577_v27 = vpop.permute.xlu1 %1484 }
  0xd5   : > { %v3593_v17 = vpop.permute.xlu1 %1474 }
 0x177   : > { %v3154_v47 = vpop.f32.mrf.mxu0 }
 0x178   : > { %v988_v56 = vadd.f32 %v3154_v47, %v3500_v9  ;;  %v3573_v9 = vpop.permute.xlu0 %1479 }
 0x179   : > { %v982_v49 = vpop.f32.mrf.mxu0 }
 0x17a   : > { %v983_v20 = vadd.f32 %v982_v49, %v3461_v57 }
 0x17b   : > { %v3157_v52 = vpop.f32.mrf.mxu0 }
 0x17c   : > { %v998_v54 = vadd.f32 %v3157_v52, %v3498_v8  ;;  %v1431_v8 = vmul.f32 %v1414_v51, %v3512_v14  ;;  %v1001_v34 = vmax.f32 %v983_v20, 0.0  ;;  %v3006_v14 = vld [vmem:[%s3426_s24 + $0x28] sm:$0xff]  ;;  %v3591_v44 = vpop.permute.xlu0 %1469  ;;  %v3007_v51 = vld [vmem:[%s3426_s24 + $0x30] sm:$0xff] }
 0x17d   : > { %v992_v58 = vpop.f32.mrf.mxu0 }
 0x17e   : > { %v1004_v59 = vmax.f32 %v998_v54, 0.0  ;;  %v993_v62 = vadd.f32 %v992_v58, %v3455_v53  ;;  %v1002_v53 = vmax.f32 %v988_v56, 0.0  ;;  %v1191_v58 = vld [vmem:[%s4111_s4 + $0x10] sm:$0xff] }
 0x17f   : > { %v1261_v21 = vpop.f32.mrf.mxu0 }
 0x180   : > { %v1003_v22 = vmax.f32 %v993_v62, 0.0  ;;  %v1365_v23 = vrot.slane %v1261_v21, %v3451_v32  ;;  %3158 = vmatprep.subr.mxu1 %v1004_v59 }
 0x181   : > { %3159 = vmatpush3.msra.mxu1 %v1004_v59  ;;  %v1263_v26 = vpop.f32.mrf.mxu0 }
 0x182   : > { %v1378_v57 = vmul.f32 %v1365_v23, %v3504_v11  ;;  %v1386_v28 = vmul.f32 %v1365_v23, %v3554_v46  ;;  %v1390_v29 = vmul.f32 %v1365_v23, %v3472_v63  ;;  %v1382_v33 = vmul.f32 %v1365_v23, %v3557_v50  ;;  %3160 = vmatprep.subr.mxu1 %v1003_v22 }
 0x183   : > { %v1369_v35 = vrot.slane %v1263_v26, %v3451_v32  ;;  %3161 = vmatpush3.msra.mxu1 %v1003_v22  ;;  %v3008_v22 = vld [vmem:[%s3426_s24 + $0x38] sm:$0xff] }
 0x184   : > { %3162 = vmatprep.subr.mxu1 %v1002_v53  ;;  %v1455_v36 = vadd.f32 %v1439_v3, %v1386_v28  ;;  %v1459_v37 = vadd.f32 %v1443_v2, %v1390_v29  ;;  %v1447_v38 = vadd.f32 %v1431_v8, %v1378_v57  ;;  %v1451_v39 = vadd.f32 %v1435_v1, %v1382_v33 }
 0x185   : > { %v1379_v40 = vmul.f32 %v1369_v35, %v3504_v11  ;;  %v1383_v41 = vmul.f32 %v1369_v35, %v3557_v50  ;;  %v1387_v42 = vmul.f32 %v1369_v35, %v3554_v46  ;;  %v1391_v43 = vmul.f32 %v1369_v35, %v3472_v63  ;;  %3163 = vmatpush3.msra.mxu1 %v1002_v53  ;;  %v1520_v35 = vld [vmem:[%s3618_s30 + $0x8] sm:$0xff] }
 0x186   : > { %v1495_v47 = vadd.f32 %v3573_v9, %v1455_v36  ;;  %v1499_v49 = vadd.f32 %v3577_v27, %v1459_v37  ;;  %3164 = vmatprep.subr.mxu1 %v1001_v34  ;;  %v1487_v59 = vadd.f32 %v3591_v44, %v1447_v38  ;;  %v1491_v62 = vadd.f32 %v3593_v17, %v1451_v39  ;;  %v1521_v36 = vld [vmem:[%s3618_s30 + $0x10] sm:$0xff]  ;;  %v1522_v37 = vld [vmem:[%s3618_s30 + $0x18] sm:$0xff] }
 0x187   : > { %v1456_v52 = vadd.f32 %v1440_v25, %v1387_v42  ;;  %v1460_v54 = vadd.f32 %v1444_v24, %v1391_v43  ;;  %3165 = vmatpush3.msra.mxu1 %v1001_v34  ;;  %v1448_v55 = vadd.f32 %v1432_v5, %v1379_v40  ;;  %v1452_v56 = vadd.f32 %v1436_v10, %v1383_v41  ;;  %v1519_v5 = vld [vmem:[%s3618_s30] sm:$0xff]  ;;  %v3642_v40 = vpop.permute.xlu1 %1554 }
 0x188   : > { %3167 = vmatmul.mubr.msk.f32.vlgmr.msra.gmra.mxu1 %vm903_vm0, %v3006_v14  ;;  %1296 = vmatprep.subr.mxu1 %v1192_v45  ;;  %v1511_v8 = vmax.f32 %v1495_v47, 0.0  ;;  %v1515_v23 = vmax.f32 %v1499_v49, 0.0  ;;  %v1503_v26 = vmax.f32 %v1487_v59, 0.0  ;;  %v1507_v57 = vmax.f32 %v1491_v62, 0.0 }
 0x189   : > { %v1496_v2 = vadd.f32 %v3573_v9, %v1456_v52  ;;  %v1500_v3 = vadd.f32 %v3577_v27, %v1460_v54  ;;  %v1488_v20 = vadd.f32 %v3591_v44, %v1448_v55  ;;  %3169 = vmatprep.mubr.msk.f32.mxu1 %vm903_vm0, %v3007_v51  ;;  %v1492_v21 = vadd.f32 %v3593_v17, %v1452_v56 }
 0x18a   : > { %1297 = vmatpush1.msra.mxu1 %v1191_v58  ;;  %v1529_v33 = vpack.c.bf16 %v1515_v23, %v1511_v8  ;;  %v1525_v34 = vpack.c.bf16 %v1507_v57, %v1503_v26  ;;  %v3626_v10 = vpack.c.bf16 %v1520_v35, %v1519_v5  ;;  %v3633_v38 = vpack.c.bf16 %v1522_v37, %v1521_v36 }
 0x18b   : > { %v1512_v1 = vmax.f32 %v1496_v2, 0.0  ;;  %v1516_v24 = vmax.f32 %v1500_v3, 0.0  ;;  %v1504_v53 = vmax.f32 %v1488_v20, 0.0  ;;  %v1508_v25 = vmax.f32 %v1492_v21, 0.0  ;;  %v3646_v42 = vpop.permute.xlu1 %1544 }
 0x18c   : > { %3170 = vmatmul.mubr.msk.f32.gmra.mxu1 %vm903_vm0, %v3008_v22 }
 0x18d   : > { %v1530_v28 = vpack.c.bf16 %v1516_v24, %v1512_v1  ;;  %1330 = vmatprep.mubr.f32.mxu1 %v3259_v4  ;;  %v1526_v29 = vpack.c.bf16 %v1508_v25, %v1504_v53 }
 0x18f   : > { %1575 = vmatprep.subr.bf16.mxu0 %v1530_v28  ;;  %v3650_v14 = vpop.permute.xlu1 %1712 }
 0x190   : > { %1576 = vmatpush1.bf16.msra.mxu0 %v1529_v33  ;;  %3018 = vmatmul.mubr.msk.f32.vlgmr.msra.gmra.mxu1 %vm1164_vm1, %v3448_v31  ;;  %v3638_v31 = vpop.permute.xlu0 %1549 }
 0x191   : > { %1577 = vmatprep.subr.bf16.mxu0 %v1526_v29  ;;  %1648 = vmatprep.mubr.bf16.mxu1 %v3257_v0 }
 0x193   : > { %v3654_v47 = vpop.permute.xlu1 %1722 }
 0x194   : > { %1578 = vmatpush1.bf16.msra.mxu0 %v1525_v34  ;;  %v3640_v39 = vpop.permute.xlu0 %1539 }
 0x197   : > { %3019 = vmatmul.mubr.msk.bf16.vlgmr.msra.gmra.mxu0 %vm903_vm0, %v3626_v10  ;;  %v3658_v51 = vpop.permute.xlu1 %1864 }
 0x198   : > { %1605 = vmatprep.mubr.bf16.mxu0 %v3257_v0  ;;  %v3644_v41 = vpop.permute.xlu0 %1707 }
 0x19b   : > { %v3662_v54 = vpop.permute.xlu1 %1874 }
 0x19c   : > { %v3648_v43 = vpop.permute.xlu0 %1717 }
 0x19f   : > { %3020 = vmatmul.mubr.msk.bf16.gmra.mxu0 %vm903_vm0, %v3633_v38  ;;  %v1018_v56 = vpop.permute.xlu1 %1017 }
 0x1a0   : > { %1763 = vmatprep.mubr.bf16.mxu0 %v3257_v0  ;;  %v3652_v45 = vpop.permute.xlu0 %1859 }
 0x1a3   : > { %v1028_v59 = vpop.permute.xlu1 %1027 }
 0x1a4   : > { %v3656_v49 = vpop.permute.xlu0 %1869 }
 0x1a7   : > { %v1143_v8 = vpop.permute.xlu1 %1142 }
 0x1a8   : > { %v3660_v52 = vpop.permute.xlu0 %1932 }
 0x1ab   : > { %v1153_v37 = vpop.permute.xlu1 %1152 }
 0x1ac   : > { %v1023_v55 = vpop.permute.xlu0 %1022 }
 0x1b0   : > { %v1033_v58 = vpop.permute.xlu0 %1032 }
 0x1b4   : > { %v1148_v20 = vpop.permute.xlu0 %1147 }
 0x1b8   : > { %v1158_v35 = vpop.permute.xlu0 %1157 }
 0x248   : > { %v3168_v62 = vpop.f32.mrf.mxu1 }
 0x249   : > { %v1119_v2 = vadd.f32 %v3168_v62, %v1023_v55 }
 0x24a   : > { %v1113_v3 = vpop.f32.mrf.mxu1 }
 0x24b   : > { %v1133_v21 = vmax.f32 %v1119_v2, 0.0  ;;  %v1114_v22 = vadd.f32 %v1113_v3, %v1018_v56 }
 0x24c   : > { %v3171_v23 = vpop.f32.mrf.mxu1 }
 0x24d   : > { %v1132_v1 = vmax.f32 %v1114_v22, 0.0  ;;  %v1161_v24 = vmul.f32 %v1148_v20, %v1133_v21  ;;  %v1129_v53 = vadd.f32 %v3171_v23, %v1033_v58 }
 0x24e   : > { %v1123_v25 = vpop.f32.mrf.mxu1 }
 0x24f   : > { %v1124_v26 = vadd.f32 %v1123_v25, %v1028_v59  ;;  %v1160_v57 = vmul.f32 %v1143_v8, %v1132_v1  ;;  %v1135_v28 = vmax.f32 %v1129_v53, 0.0  ;;  %v1166_v33 = vsel %vm1164_vm1, %v1161_v24, 0.0 }
 0x250   : > { %v1332_v29 = vpop.f32.mrf.mxu1 }
 0x251   : > { %v1134_v34 = vmax.f32 %v1124_v26, 0.0  ;;  %v1165_v5 = vsel %vm1164_vm1, %v1160_v57, 0.0  ;;  %v1373_v36 = vrot.slane %v1332_v29, %v3451_v32  ;;  %v1163_v2 = vmul.f32 %v1158_v35, %v1135_v28 }
 0x252   : > { %v1167_v55 = vadd.f32 %v1166_v33, %v1165_v5  ;;  %v1334_v56 = vpop.f32.mrf.mxu1 }
 0x253   : > { %v1380_v62 = vmul.f32 %v1373_v36, %v3504_v11  ;;  %v1388_v58 = vmul.f32 %v1373_v36, %v3554_v46  ;;  %v1392_v59 = vmul.f32 %v1373_v36, %v3472_v63  ;;  %v1377_v3 = vrot.slane %v1334_v56, %v3451_v32 }
 0x254   : > { %v1162_v20 = vmul.f32 %v1153_v37, %v1134_v34  ;;  %v1384_v21 = vmul.f32 %v1373_v36, %v3557_v50  ;;  %v1170_v29 = vsel %vm1164_vm1, %v1163_v2, 0.0 }
 0x255   : > { %v1449_v22 = vadd.f32 %v3515_v15, %v1380_v62  ;;  %v1457_v8 = vadd.f32 %v3507_v12, %v1388_v58  ;;  %v1461_v23 = vadd.f32 %v3492_v6, %v1392_v59  ;;  %v1381_v1 = vmul.f32 %v1377_v3, %v3504_v11 }
 0x256   : > { %v1385_v24 = vmul.f32 %v1377_v3, %v3557_v50  ;;  %v1389_v53 = vmul.f32 %v1377_v3, %v3554_v46  ;;  %v1393_v25 = vmul.f32 %v1377_v3, %v3472_v63  ;;  %v1168_v26 = vsel %vm1164_vm1, %v1162_v20, 0.0 }
 0x257   : > { %v1597_v57 = vpop.f32.mrf.mxu0  ;;  %v1497_v28 = vadd.f32 %v3573_v9, %v1457_v8  ;;  %v1169_v15 = vadd.f32 %v1168_v26, %v1167_v55  ;;  %v1501_v6 = vadd.f32 %v3577_v27, %v1461_v23  ;;  %v1450_v46 = vadd.f32 %v3518_v16, %v1381_v1 }
 0x258   : > { %v1458_v12 = vadd.f32 %v3510_v13, %v1389_v53  ;;  %v1462_v11 = vadd.f32 %v3495_v7, %v1393_v25  ;;  %v1454_v63 = vadd.f32 %v3526_v19, %v1385_v24  ;;  %v1453_v34 = vadd.f32 %v3523_v18, %v1384_v21  ;;  %v1182_v24 = vpop.permute.xlu1 %1181 }
 0x259   : > { %v1599_v33 = vpop.f32.mrf.mxu0  ;;  %v1513_v50 = vmax.f32 %v1497_v28, 0.0  ;;  %v1171_v5 = vadd.f32 %v1170_v29, %v1169_v15  ;;  %v1489_v36 = vadd.f32 %v3591_v44, %v1449_v22  ;;  %v1517_v55 = vmax.f32 %v1501_v6, 0.0 }
 0x25a   : > { %v1498_v35 = vadd.f32 %v3573_v9, %v1458_v12  ;;  %v1502_v13 = vadd.f32 %v3577_v27, %v1462_v11  ;;  %v1490_v56 = vadd.f32 %v3591_v44, %v1450_v46  ;;  %v1494_v7 = vadd.f32 %v3593_v17, %v1454_v63 }
 0x25b   : > { %v1601_v37 = vpop.f32.mrf.mxu0  ;;  %v1172_v62 = vrot.slane %v1171_v5, 4  ;;  %v1531_v2 = vpack.c.bf16 %v1517_v55, %v1513_v50  ;;  %v1493_v9 = vadd.f32 %v3593_v17, %v1453_v34  ;;  %v1505_v22 = vmax.f32 %v1489_v36, 0.0 }
 0x25c   : > { %v1514_v16 = vmax.f32 %v1498_v35, 0.0  ;;  %v1518_v19 = vmax.f32 %v1502_v13, 0.0  ;;  %v1506_v18 = vmax.f32 %v1490_v56, 0.0  ;;  %v1510_v59 = vmax.f32 %v1494_v7, 0.0 }
 0x25d   : > { %v1603_v58 = vpop.f32.mrf.mxu0  ;;  %v1173_v3 = vadd.f32 %v1172_v62, %v1171_v5  ;;  %v1509_v23 = vmax.f32 %v1493_v9, 0.0  ;;  %v1600_v6 = vadd.f32 %v1599_v33, %v3640_v39  ;;  %v1187_v50 = vrot.slane %v1182_v24, %v3451_v32 }
 0x25e   : > { %v1532_v21 = vpack.c.bf16 %v1518_v19, %v1514_v16  ;;  %v1528_v27 = vpack.c.bf16 %v1510_v59, %v1506_v18  ;;  %v1604_v17 = vadd.f32 %v1603_v58, %v3646_v42  ;;  %v2174_v63 = vstv %s3695_s0  ;;  %v3023_v59 = vld [vmem:[%s3618_s30 + $0x20] sm:$0xff]  ;;  %s3269_s0 = smov 96  }
 0x25f   : > { %v1607_v20 = vpop.f32.mrf.mxu0  ;;  %v1174_v8 = vrot.slane %v1173_v3, 2  ;;  %v1527_v25 = vpack.c.bf16 %v1509_v23, %v1505_v22  ;;  %v1602_v34 = vadd.f32 %v1601_v37, %v3646_v42  ;;  %v1598_v56 = vadd.f32 %v1597_v57, %v3640_v39  ;;  %v3024_v57 = vld [vmem:[%s3618_s30 + $0x28] sm:$0xff] }
 0x260   : > { %1628 = vmatprep.subr.bf16.mxu1 %v1532_v21  ;;  %v1608_v15 = vadd.f32 %v1607_v20, %v3638_v31  ;;  %v1674_v36 = vmax.f32 %v1604_v17, 0.0  ;;  %v1670_v33 = vmax.f32 %v1600_v6, 0.0  ;;  %v3715_v20 = vpack.c.bf16 %v3024_v57, %v3023_v59 }
 0x261   : > { %v1609_v44 = vpop.f32.mrf.mxu0  ;;  %v1175_v1 = vadd.f32 %v1174_v8, %v1173_v3  ;;  %1629 = vmatpush1.bf16.msra.mxu1 %v1531_v2  ;;  %v1673_v37 = vmax.f32 %v1602_v34, 0.0  ;;  %v1669_v18 = vmax.f32 %v1598_v56, 0.0  ;;  %v3025_v8 = vld [vmem:[%s3618_s30 + $0x30] sm:$0xff]  ;;  %v3261_v17 = vmov 2475754826  }
 0x262   : > { %1630 = vmatprep.subr.bf16.mxu1 %v1528_v27  ;;  %v1610_v28 = vadd.f32 %v1609_v44, %v3638_v31  ;;  %v1677_v7 = vmax.f32 %v1608_v15, 0.0  ;;  %v1693_v2 = vpack.c.bf16 %v1674_v36, %v1670_v33  ;;  %v3026_v44 = vld [vmem:[%s3618_s30 + $0x38] sm:$0xff]  ;;  %v3262_v15 = vmov 2131351028   ;;  %s4052_s30 = scalar_lea.vmem %s4125_s18, %s3401_s2  ;;  %s3268_s2 = smov 112  }
 0x263   : > { %v1611_v53 = vpop.f32.mrf.mxu0  ;;  %v1176_v26 = vrot.slane %v1175_v1, 1  ;;  %v3728_v24 = vpack.c.bf16 %v3026_v44, %v3025_v8 }
 0x264   : > { %v1612_v29 = vadd.f32 %v1611_v53, %v3642_v40  ;;  %v1678_v13 = vmax.f32 %v1610_v28, 0.0 }
 0x265   : > { %v1613_v12 = vpop.f32.mrf.mxu0  ;;  %v1177_v11 = vadd.f32 %v1176_v26, %v1175_v1  ;;  %1631 = vmatpush1.bf16.msra.mxu1 %v1527_v25  ;;  %v3260_v25 = vmov 683565275  }
 0x266   : > { %v1614_v46 = vadd.f32 %v1613_v12, %v3642_v40  ;;  %v1681_v5 = vmax.f32 %v1612_v29, 0.0 }
 0x267   : > { %v1188_v35 = vadd.f32 %v1187_v50, %v1177_v11  ;;  %v3263_v11 = vmov 2102212464  }
 0x268   : > { %v1682_v55 = vmax.f32 %v1614_v46, 0.0  ;;  %3021 = vmatmul.mubr.msk.bf16.vlgmr.msra.gmra.mxu1 %vm903_vm0, %v3626_v10  ;;  %v1696_v58 = vpack.c.bf16 %v1681_v5, %v1677_v7  ;;  %v1692_v10 = vpack.c.bf16 %v1673_v37, %v1669_v18 }
 0x269   : > { %v3709_v62 = vmul.f32 %v2174_v63, %v1188_v35  ;;  %1658 = vmatprep.mubr.bf16.mxu1 %v3257_v0  ;;  %v3264_v63 = vmov 920167782   ;;  %v3265_v35 = vmov 1326507024  }
 0x26a   : > { %v1697_v16 = vpack.c.bf16 %v1682_v55, %v1678_v13 }
 0x26b   : > { %v2182_v19 = vand.u32 2139095040, %v3709_v62  ;;  %v2179_v27 = vand.u32 2147483647, %v3709_v62  ;;  %vm2181_vm9 = vcmp.lt.s32.totalorder %v3709_v62, 0 }
 0x26c   : > { %1743 = vmatprep.subr.bf16.mxu0 %v1697_v16 }
 0x26d   : > { %1744 = vmatpush1.bf16.msra.mxu0 %v1696_v58  ;;  %v2183_v3 = vshrl.u32 %v2182_v19, 23  ;;  %v2186_v1 = vand.u32 8388607, %v2179_v27  ;;  %vm2180_vm10 = vcmp.le.f32.partialorder %v2179_v27, 0.7853982 }
 0x26e   : > { %1745 = vmatprep.subr.bf16.mxu0 %v1693_v2 }
 0x26f   : > { %v3035_v9 = vadd.s32 4294967169, %v2183_v3  ;;  %v2187_v13 = vor.u32 8388608, %v2186_v1 }
 0x270   : > { %3022 = vmatmul.mubr.msk.bf16.gmra.mxu1 %vm903_vm0, %v3633_v38 }
 0x271   : > { %1746 = vmatpush1.bf16.msra.mxu0 %v1692_v10  ;;  %v2189_v21 = vadd.s32 1, %v3035_v9  ;;  %1816 = vmatprep.mubr.bf16.mxu1 %v3257_v0  ;;  %v2227_v10 = vshll.u32 %v2187_v13, 8 }
 0x273   : > { %vm2190_vm2 = vcmp.gt.s32.totalorder %v2189_v21, 0 }
 0x274   : > { %3031 = vmatmul.mubr.msk.bf16.vlgmr.msra.gmra.mxu0 %vm903_vm0, %v3715_v20  ;;  %v2191_v22 = vsel %vm2190_vm2, %v2189_v21, 0 }
 0x275   : > { %1773 = vmatprep.mubr.bf16.mxu0 %v3257_v0  ;;  %v2193_v23 = vand.u32 31, %v2191_v22  ;;  %v2192_v53 = vshrl.u32 %v2191_v22, 5 }
 0x277   : > { %v2194_v38 = vsub.s32 32, %v2193_v23  ;;  %v2196_v26 = vshll.u32 %v3260_v25, %v2193_v23  ;;  %v2199_v28 = vshll.u32 %v3261_v17, %v2193_v23  ;;  %v2202_v6 = vshll.u32 %v3262_v15, %v2193_v23 }
 0x278   : > { %v2205_v46 = vshll.u32 %v3263_v11, %v2193_v23  ;;  %v2208_v5 = vshll.u32 %v3264_v63, %v2193_v23  ;;  %vm2211_vm3 = vcmp.lt.s32.totalorder %v2192_v53, 1  ;;  %vm2214_vm4 = vcmp.lt.s32.totalorder %v2192_v53, 4 }
 0x279   : > { %v2197_v29 = vshrl.u32 %v3261_v17, %v2194_v38  ;;  %v2200_v12 = vshrl.u32 %v3262_v15, %v2194_v38  ;;  %v2203_v50 = vshrl.u32 %v3263_v11, %v2194_v38  ;;  %v2206_v34 = vshrl.u32 %v3264_v63, %v2194_v38 }
 0x27a   : > { %v2209_v36 = vshrl.u32 %v3265_v35, %v2194_v38  ;;  %v2195_v2 = vshrl.u32 %v3260_v25, %v2194_v38  ;;  %vm2213_vm5 = vcmp.lt.s32.totalorder %v2192_v53, 3  ;;  %vm2212_vm6 = vcmp.lt.s32.totalorder %v2192_v53, 2 }
 0x27b   : > { %v2198_v55 = vor.u32 %v2197_v29, %v2196_v26  ;;  %v2201_v56 = vor.u32 %v2200_v12, %v2199_v28  ;;  %v2204_v7 = vor.u32 %v2203_v50, %v2202_v6  ;;  %v2207_v33 = vor.u32 %v2206_v34, %v2205_v46 }
 0x27c   : > { %3032 = vmatmul.mubr.msk.bf16.gmra.mxu0 %vm903_vm0, %v3728_v24  ;;  %v2210_v16 = vor.u32 %v2209_v36, %v2208_v5 }
 0x27d   : > { %v2216_v37 = vsel %vm2214_vm4, %v2204_v7, 2102212464  ;;  %v2219_v58 = vsel %vm2211_vm3, %v2198_v55, %v2201_v56  ;;  %v2223_v19 = vsel %vm2211_vm3, %v2201_v56, %v2204_v7  ;;  %v2220_v18 = vsel %vm2214_vm4, %v2207_v33, 920167782 }
 0x27e   : > { %v2224_v59 = vsel %vm2214_vm4, %v2210_v16, 1326507024  ;;  %v2221_v57 = vsel %vm2213_vm5, %v2204_v7, %v2220_v18  ;;  %v2215_v9 = vsel %vm2211_vm3, %v2195_v2, %v2198_v55  ;;  %v2217_v21 = vsel %vm2213_vm5, %v2201_v56, %v2216_v37 }
 0x27f   : > { %v2225_v3 = vsel %vm2213_vm5, %v2207_v33, %v2224_v59  ;;  %v2222_v22 = vsel %vm2212_vm6, %v2219_v58, %v2221_v57  ;;  %v2218_v17 = vsel %vm2212_vm6, %v2215_v9, %v2217_v21  ;;  %vm2271_vm4 = vweird.f32 %v3709_v62 }
 0x280   : > { %v2226_v8 = vsel %vm2212_vm6, %v2223_v19, %v2225_v3  ;;  %v3735_v1 = vmul.u32.u64.low %v2227_v10, %v2222_v22  ;;  %v3736_v26 = vmul.u32.u64.high %v2227_v10, %v2222_v22, %v3735_v1  ;;  %v2234_v25 = vmul.u32 %v2227_v10, %v2218_v17 }
 0x281   : > { %v3732_v44 = vmul.u32.u64.low %v2227_v10, %v2226_v8  ;;  %v3733_v23 = vmul.u32.u64.high %v2227_v10, %v2226_v8, %v3732_v44  ;;  %vm2718_vm5 = vcmask 125952  }
 0x282   : > { %v2237_v38 = vadd.s32 1, %v3736_v26  ;;  %2719 = vst.msk [vmem:[%s4052_s30 + $0x8] sm:$0xf] %vm2718_vm5, %v3259_v4  ;;  %2721 = vst.msk [vmem:[%s4052_s30 + $0x18] sm:$0xf] %vm2718_vm5, %v3259_v4 }
 0x283   : > { %vm2236_vm7 = vc.u32 %v3733_v23, %v3735_v1  ;;  %v2235_v5 = vadd.s32 %v3735_v1, %v3733_v23 }
 0x284   : > { %v2238_v53 = vsel %vm2236_vm7, %v2237_v38, %v3736_v26 }
 0x285   : > { %v2239_v28 = vadd.s32 %v2238_v53, %v2234_v25 }
 0x287   : > { %v2240_v29 = vadd.s32 536870912, %v2239_v28 }
 0x289   : > { %v2241_v15 = vshrl.u32 %v2240_v29, 30 }
 0x28b   : > { %v2242_v12 = vshll.u32 %v2241_v15, 30  ;;  %v2265_v18 = vsub.s32 4, %v2241_v15 }
 0x28d   : > { %v2243_v6 = vsub.s32 %v2239_v28, %v2242_v12  ;;  %v2266_v3 = vsel %vm2181_vm9, %v2265_v18, %v2241_v15  ;;  %v2000_v12 = vld [vmem:[%s4112_s5 + $0xf8] sm:$0xff]  ;;  %v1974_v18 = vld [vmem:[%s4112_s5 + $0x28] sm:$0xff] }
 0x28e   : > { %v2268_v10 = vsel %vm2180_vm10, 0, %v2266_v3  ;;  %3074 = vmatprep.subr.mxu0 %v2000_v12  ;;  %v1988_v3 = vld [vmem:[%s4112_s5 + $0x98] sm:$0xff] }
 0x28f   : > { %v2245_v11 = vsub.s32 0, %v2243_v6  ;;  %v2375_v9 = vadd.s32 3, %v2268_v10  ;;  %v2272_v21 = vand.u32 3, %v2268_v10  ;;  %v1972_v10 = vld [vmem:[%s4112_s5 + $0x18] sm:$0xff] }
 0x291   : > { %v3036_v50 = vmin.u32 %v2245_v11, %v2243_v6  ;;  %v2376_v22 = vand.u32 3, %v2375_v9  ;;  %vm2277_vm12 = vcmp.eq.s32.totalorder %v2272_v21, 2  ;;  %vm2274_vm14 = vcmp.eq.s32.totalorder %v2272_v21, 0  ;;  %v1983_v11 = vld [vmem:[%s4112_s5 + $0x70] sm:$0xff] }
 0x292   : > { %vm2273_vm2 = vcmp.lt.s32.totalorder %v2272_v21, 2  ;;  %v1987_v9 = vld [vmem:[%s4112_s5 + $0x90] sm:$0xff] }
 0x293   : > { %v2247_v46 = vclz %v3036_v50  ;;  %vm2381_vm13 = vcmp.eq.s32.totalorder %v2376_v22, 2  ;;  %vm2378_vm15 = vcmp.eq.s32.totalorder %v2376_v22, 0  ;;  %vm2377_vm3 = vcmp.lt.s32.totalorder %v2376_v22, 2  ;;  %v1998_v50 = vld [vmem:[%s4112_s5 + $0xe8] sm:$0xff]  ;;  %v1971_v21 = vld [vmem:[%s4112_s5 + $0x10] sm:$0xff] }
 0x294   : > { %v1986_v22 = vld [vmem:[%s4112_s5 + $0x88] sm:$0xff] }
 0x295   : > { %v3037_v63 = vadd.s32 4294967294, %v2247_v46  ;;  %v1982_v46 = vld [vmem:[%s4112_s5 + $0x68] sm:$0xff] }
 0x297   : > { %vm3038_vm8 = vcmp.lt.s32.totalorder %v3037_v63, 0 }
 0x298   : > { %v2250_v34 = vsel %vm3038_vm8, 0, %v3037_v63  ;;  %v1997_v63 = vld [vmem:[%s4112_s5 + $0xe0] sm:$0xff] }
 0x299   : > { %v2251_v35 = vsub.s32 32, %v2250_v34  ;;  %v2255_v36 = vsub.s32 4294967266, %v2250_v34  ;;  %v2252_v13 = vshll.u32 %v2243_v6, %v2250_v34  ;;  %v1984_v6 = vld [vmem:[%s4112_s5 + $0x78] sm:$0xff]  ;;  %v1981_v34 = vld [vmem:[%s4112_s5 + $0x60] sm:$0xff] }
 0x29a   : > { %3075 = vmatpush3.msra.mxu0 %v1984_v6 }
 0x29b   : > { %v2253_v55 = vshrl.u32 %v2235_v5, %v2251_v35  ;;  %v2256_v56 = vadd.s32 127, %v2255_v36  ;;  %v1996_v5 = vld [vmem:[%s4112_s5 + $0xd8] sm:$0xff]  ;;  %v1995_v36 = vld [vmem:[%s4112_s5 + $0xd0] sm:$0xff] }
 0x29c   : > { %v1980_v35 = vld [vmem:[%s4112_s5 + $0x58] sm:$0xff] }
 0x29d   : > { %v2254_v7 = vor.u32 %v2253_v55, %v2252_v13  ;;  %v2257_v33 = vshll.u32 %v2256_v56, 23  ;;  %v1979_v13 = vld [vmem:[%s4112_s5 + $0x50] sm:$0xff]  ;;  %v1994_v55 = vld [vmem:[%s4112_s5 + $0xc8] sm:$0xff] }
 0x29e   : > { %v1978_v56 = vld [vmem:[%s4112_s5 + $0x48] sm:$0xff] }
 0x29f   : > { %v2258_v16 = vor.u32 4788187, %v2257_v33  ;;  %v2261_v58 = vcvt.s32.f32 %v2254_v7  ;;  %v1993_v7 = vld [vmem:[%s4112_s5 + $0xc0] sm:$0xff] }
 0x2a0   : > { %v1977_v33 = vld [vmem:[%s4112_s5 + $0x40] sm:$0xff] }
 0x2a1   : > { %v2259_v37 = vand.u32 2147483647, %v2258_v16  ;;  %v1992_v16 = vld [vmem:[%s4112_s5 + $0xb8] sm:$0xff] }
 0x2a3   : > { %v2262_v19 = vmul.f32 %v2261_v58, %v2259_v37  ;;  %v1976_v37 = vld [vmem:[%s4112_s5 + $0x38] sm:$0xff]  ;;  %v1991_v58 = vld [vmem:[%s4112_s5 + $0xb0] sm:$0xff] }
 0x2a5   : > { %v2263_v2 = vxor.u32 2147483648, %v2262_v19 }
 0x2a7   : > { %v2264_v59 = vsel %vm2181_vm9, %v2263_v2, %v2262_v19  ;;  %v1975_v19 = vld [vmem:[%s4112_s5 + $0x30] sm:$0xff]  ;;  %v1990_v2 = vld [vmem:[%s4112_s5 + $0xa8] sm:$0xff] }
 0x2a8   : > { %v2267_v57 = vsel %vm2180_vm10, %v3709_v62, %v2264_v59  ;;  %v1999_v62 = vld [vmem:[%s4112_s5 + $0xf0] sm:$0xff]  ;;  %v1989_v59 = vld [vmem:[%s4112_s5 + $0xa0] sm:$0xff] }
 0x2a9   : > { %3221 = vcosq.f32 %v2267_v57  ;;  %3076 = vmatprep.subr.mxu0 %v1999_v62 }
 0x2aa   : > { %3223 = vsinq.f32 %v2267_v57  ;;  %3077 = vmatpush3.msra.mxu0 %v1983_v11  ;;  %v1973_v57 = vld [vmem:[%s4112_s5 + $0x20] sm:$0xff] }
 0x2ab   : > { %3078 = vmatprep.subr.mxu0 %v1998_v50 }
 0x2ac   : > { %3079 = vmatpush3.msra.mxu0 %v1982_v46 }
 0x2ad   : > { %3080 = vmatprep.subr.mxu0 %v1997_v63 }
 0x2ae   : > { %3081 = vmatpush3.msra.mxu0 %v1981_v34 }
 0x2af   : > { %3082 = vmatprep.subr.mxu0 %v1996_v5 }
 0x2b0   : > { %3083 = vmatpush3.msra.mxu0 %v1980_v35 }
 0x2b1   : > { %3084 = vmatprep.subr.mxu0 %v1995_v36 }
 0x2b2   : > { %3085 = vmatpush3.msra.mxu0 %v1979_v13 }
 0x2b3   : > { %3086 = vmatprep.subr.mxu0 %v1994_v55 }
 0x2b4   : > { %3087 = vmatpush3.msra.mxu0 %v1978_v56 }
 0x2b5   : > { %3088 = vmatprep.subr.mxu0 %v1993_v7 }
 0x2b6   : > { %v3222_v8 = vpop.eup %3221  ;;  %3089 = vmatpush3.msra.mxu0 %v1977_v33 }
 0x2b7   : > { %v3224_v44 = vpop.eup %3223  ;;  %v2278_v23 = vxor.u32 2147483648, %v3222_v8  ;;  %3090 = vmatprep.subr.mxu0 %v1992_v16 }
 0x2b8   : > { %v2275_v1 = vxor.u32 2147483648, %v3224_v44  ;;  %3091 = vmatpush3.msra.mxu0 %v1976_v37 }
 0x2b9   : > { %v2279_v27 = vsel %vm2277_vm12, %v2278_v23, %v3224_v44  ;;  %v2383_v26 = vsel %vm2381_vm13, %v2278_v23, %v3224_v44  ;;  %3092 = vmatprep.subr.mxu0 %v1991_v58  ;;  %v1985_v44 = vld [vmem:[%s4112_s5 + $0x80] sm:$0xff] }
 0x2ba   : > { %v2276_v17 = vsel %vm2274_vm14, %v3222_v8, %v2275_v1  ;;  %v2380_v38 = vsel %vm2378_vm15, %v3222_v8, %v2275_v1  ;;  %3093 = vmatpush3.msra.mxu0 %v1975_v19  ;;  %v1970_v8 = vld [vmem:[%s4112_s5 + $0x8] sm:$0xff]  ;;  %v1969_v23 = vld [vmem:[%s4112_s5] sm:$0xff] }
 0x2bb   : > { %v2280_v25 = vsel %vm2273_vm2, %v2276_v17, %v2279_v27  ;;  %v2384_v53 = vsel %vm2377_vm3, %v2380_v38, %v2383_v26  ;;  %3094 = vmatprep.subr.mxu0 %v1990_v2  ;;  %v3225_v1 = vld [vmem:[%s4111_s4 + $0x8] sm:$0xff] }
 0x2bc   : > { %v2281_v28 = vsel %vm2271_vm4, nan, %v2280_v25  ;;  %v2385_v29 = vsel %vm2271_vm4, nan, %v2384_v53  ;;  %3095 = vmatpush3.msra.mxu0 %v1974_v18 }
 0x2bd   : > { %v3750_v15 = vsel %vm2178_vm11, %v2281_v28, %v2385_v29  ;;  %3096 = vmatprep.subr.mxu0 %v1989_v59 }
 0x2be   : > { %3097 = vmatpush3.msra.mxu0 %v1973_v57 }
 0x2bf   : > { %3098 = vmatprep.subr.mxu0 %v1988_v3 }
 0x2c0   : > { %3099 = vmatpush3.msra.mxu0 %v1972_v10 }
 0x2c1   : > { %3100 = vmatprep.subr.mxu0 %v1987_v9 }
 0x2c2   : > { %3101 = vmatpush3.msra.mxu0 %v1971_v21 }
 0x2c3   : > { %3102 = vmatprep.subr.mxu0 %v1986_v22 }
 0x2c4   : > { %3103 = vmatpush3.msra.mxu0 %v1970_v8 }
 0x2c5   : > { %3104 = vmatprep.subr.mxu0 %v1985_v44 }
 0x2c6   : > { %3105 = vmatpush3.msra.mxu0 %v1969_v23 }
 0x2c7   : > { %2427 = vmatprep.subr.mxu0 %v3225_v1 }
 0x328   : > { %v1650_v27 = vpop.f32.mrf.mxu1 }
 0x329   : > { %v1651_v13 = vadd.f32 %v1650_v27, %v3640_v39 }
 0x32a   : > { %v1652_v26 = vpop.f32.mrf.mxu1 }
 0x32b   : > { %v1653_v63 = vadd.f32 %v1652_v26, %v3640_v39  ;;  %v1671_v9 = vmax.f32 %v1651_v13, 0.0 }
 0x32c   : > { %v1654_v17 = vpop.f32.mrf.mxu1 }
 0x32d   : > { %v1655_v34 = vadd.f32 %v1654_v17, %v3646_v42  ;;  %v1672_v2 = vmax.f32 %v1653_v63, 0.0 }
 0x32e   : > { %v1656_v38 = vpop.f32.mrf.mxu1 }
 0x32f   : > { %v1657_v12 = vadd.f32 %v1656_v38, %v3646_v42  ;;  %v1675_v18 = vmax.f32 %v1655_v34, 0.0 }
 0x330   : > { %v1660_v25 = vpop.f32.mrf.mxu1 }
 0x331   : > { %v1661_v50 = vadd.f32 %v1660_v25, %v3638_v31  ;;  %v1676_v7 = vmax.f32 %v1657_v12, 0.0  ;;  %v1694_v27 = vpack.c.bf16 %v1675_v18, %v1671_v9  ;;  %v3883_v18 = vld [vmem:[%s4110_s3] sm:$0xf]  ;;  %v2016_v9 = vld [vmem:[%s4112_s5 + $0x178] sm:$0xff] }
 0x332   : > { %v1662_v53 = vpop.f32.mrf.mxu1 }
 0x333   : > { %v1663_v6 = vadd.f32 %v1662_v53, %v3638_v31  ;;  %v1679_v58 = vmax.f32 %v1661_v50, 0.0  ;;  %v1695_v21 = vpack.c.bf16 %v1676_v7, %v1672_v2 }
 0x334   : > { %v1765_v28 = vpop.f32.mrf.mxu0  ;;  %v1664_v29 = vpop.f32.mrf.mxu1 }
 0x335   : > { %v1665_v62 = vadd.f32 %v1664_v29, %v3642_v40  ;;  %v1766_v5 = vadd.f32 %v1765_v28, %v3644_v41  ;;  %v1680_v33 = vmax.f32 %v1663_v6, 0.0 }
 0x336   : > { %v1767_v11 = vpop.f32.mrf.mxu0  ;;  %v1666_v46 = vpop.f32.mrf.mxu1 }
 0x337   : > { %v1667_v35 = vadd.f32 %v1666_v46, %v3642_v40  ;;  %v1683_v55 = vmax.f32 %v1665_v62, 0.0  ;;  %v1768_v31 = vadd.f32 %v1767_v11, %v3644_v41  ;;  %v1837_v59 = vmax.f32 %v1766_v5, 0.0 }
 0x338   : > { %v1769_v36 = vpop.f32.mrf.mxu0 }
 0x339   : > { %v1770_v56 = vadd.f32 %v1769_v36, %v3650_v14  ;;  %v1684_v16 = vmax.f32 %v1667_v35, 0.0  ;;  %v1698_v3 = vpack.c.bf16 %v1683_v55, %v1679_v58  ;;  %v1838_v22 = vmax.f32 %v1768_v31, 0.0 }
 0x33a   : > { %v1771_v37 = vpop.f32.mrf.mxu0  ;;  %v1877_v26 = vmul.f32 %v3652_v45, %v1837_v59 }
 0x33b   : > { %v1841_v19 = vmax.f32 %v1770_v56, 0.0  ;;  %v1772_v42 = vadd.f32 %v1771_v37, %v3650_v14  ;;  %v1699_v40 = vpack.c.bf16 %v1684_v16, %v1680_v33  ;;  %v1878_v29 = vmul.f32 %v3652_v45, %v1838_v22  ;;  %v2015_v22 = vld [vmem:[%s4112_s5 + $0x170] sm:$0xff] }
 0x33c   : > { %v1775_v57 = vpop.f32.mrf.mxu0 }
 0x33d   : > { %v1842_v39 = vmax.f32 %v1772_v42, 0.0  ;;  %v1776_v10 = vadd.f32 %v1775_v57, %v3648_v43  ;;  %1796 = vmatprep.subr.bf16.mxu1 %v1699_v40  ;;  %v1881_v44 = vmul.f32 %v3658_v51, %v1841_v19  ;;  %v1948_v57 = vrot.slane %v3883_v18, %v3451_v32 }
 0x33e   : > { %v1777_v8 = vpop.f32.mrf.mxu0  ;;  %1797 = vmatpush1.bf16.msra.mxu1 %v1698_v3 }
 0x33f   : > { %v1845_v23 = vmax.f32 %v1776_v10, 0.0  ;;  %v1778_v1 = vadd.f32 %v1777_v8, %v3648_v43  ;;  %1798 = vmatprep.subr.bf16.mxu1 %v1695_v21  ;;  %v1882_v38 = vmul.f32 %v3658_v51, %v1842_v39  ;;  %v1893_v6 = vadd.f32 %v1881_v44, %v1877_v26  ;;  %v2031_v21 = vld [vmem:[%s4112_s5 + $0x1f0] sm:$0xff]  ;;  %v2030_v8 = vld [vmem:[%s4112_s5 + $0x1e8] sm:$0xff]  ;;  %v2012_v26 = vld [vmem:[%s4112_s5 + $0x158] sm:$0xff] }
 0x340   : > { %v1779_v17 = vpop.f32.mrf.mxu0  ;;  %v2014_v44 = vld [vmem:[%s4112_s5 + $0x168] sm:$0xff] }
 0x341   : > { %v1885_v25 = vmul.f32 %v3656_v49, %v1845_v23  ;;  %v1846_v53 = vmax.f32 %v1778_v1, 0.0  ;;  %v1780_v28 = vadd.f32 %v1779_v17, %v3654_v47  ;;  %v1902_v46 = vadd.f32 %v1882_v38, %v1878_v29  ;;  %v2029_v23 = vld [vmem:[%s4112_s5 + $0x1e0] sm:$0xff]  ;;  %v2027_v17 = vld [vmem:[%s4112_s5 + $0x1d0] sm:$0xff] }
 0x342   : > { %v1781_v12 = vpop.f32.mrf.mxu0  ;;  %1799 = vmatpush1.bf16.msra.mxu1 %v1694_v27  ;;  %v2013_v1 = vld [vmem:[%s4112_s5 + $0x160] sm:$0xff]  ;;  %v2028_v27 = vld [vmem:[%s4112_s5 + $0x1d8] sm:$0xff]  ;;  %v2011_v38 = vld [vmem:[%s4112_s5 + $0x150] sm:$0xff] }
 0x343   : > { %v1886_v62 = vmul.f32 %v3656_v49, %v1846_v53  ;;  %v1849_v11 = vmax.f32 %v1780_v28, 0.0  ;;  %v1782_v50 = vadd.f32 %v1781_v12, %v3654_v47  ;;  %v1894_v63 = vadd.f32 %v1893_v6, %v1885_v25  ;;  %v2026_v25 = vld [vmem:[%s4112_s5 + $0x1c8] sm:$0xff]  ;;  %v2025_v28 = vld [vmem:[%s4112_s5 + $0x1c0] sm:$0xff]  ;;  %v2024_v12 = vld [vmem:[%s4112_s5 + $0x1b8] sm:$0xff] }
 0x344   : > { %v2010_v53 = vld [vmem:[%s4112_s5 + $0x148] sm:$0xff]  ;;  %v2009_v29 = vld [vmem:[%s4112_s5 + $0x140] sm:$0xff]  ;;  %v2008_v6 = vld [vmem:[%s4112_s5 + $0x138] sm:$0xff] }
 0x345   : > { %v1889_v34 = vmul.f32 %v3662_v54, %v1849_v11  ;;  %v1850_v5 = vmax.f32 %v1782_v50, 0.0  ;;  %3033 = vmatmul.mubr.msk.bf16.vlgmr.msra.gmra.mxu1 %vm903_vm0, %v3715_v20  ;;  %v1903_v35 = vadd.f32 %v1902_v46, %v1886_v62  ;;  %v2023_v62 = vld [vmem:[%s4112_s5 + $0x1b0] sm:$0xff]  ;;  %v2022_v50 = vld [vmem:[%s4112_s5 + $0x1a8] sm:$0xff] }
 0x346   : > { %1826 = vmatprep.mubr.bf16.mxu1 %v3257_v0  ;;  %v3887_v0 = vrot.slane %v3660_v52, %v3451_v32  ;;  %v3226_v52 = vld [vmem:[%s4111_s4] sm:$0xff]  ;;  %v2007_v11 = vld [vmem:[%s4112_s5 + $0x130] sm:$0xff]  ;;  %v2006_v46 = vld [vmem:[%s4112_s5 + $0x128] sm:$0xff] }
 0x347   : > { %v1895_v36 = vadd.f32 %v1894_v63, %v1889_v34  ;;  %v1890_v13 = vmul.f32 %v3662_v54, %v1850_v5  ;;  %v2021_v63 = vld [vmem:[%s4112_s5 + $0x1a0] sm:$0xff]  ;;  %v2020_v5 = vld [vmem:[%s4112_s5 + $0x198] sm:$0xff] }
 0x348   : > { %v2005_v34 = vld [vmem:[%s4112_s5 + $0x120] sm:$0xff] }
 0x349   : > { %v1896_v55 = vrot.slane %v1895_v36, 4  ;;  %v1904_v56 = vadd.f32 %v1903_v35, %v1890_v13  ;;  %v2004_v35 = vld [vmem:[%s4112_s5 + $0x118] sm:$0xff]  ;;  %v2003_v13 = vld [vmem:[%s4112_s5 + $0x110] sm:$0xff] }
 0x34b   : > { %v1897_v7 = vadd.f32 %v1896_v55, %v1895_v36  ;;  %v1905_v33 = vrot.slane %v1904_v56, 4  ;;  %v2019_v36 = vld [vmem:[%s4112_s5 + $0x190] sm:$0xff]  ;;  %v2018_v55 = vld [vmem:[%s4112_s5 + $0x188] sm:$0xff] }
 0x34d   : > { %v1898_v16 = vrot.slane %v1897_v7, 2  ;;  %v1906_v31 = vadd.f32 %v1905_v33, %v1904_v56  ;;  %3034 = vmatmul.mubr.msk.bf16.gmra.mxu1 %vm903_vm0, %v3728_v24  ;;  %v1952_v24 = vrot.slane %v3883_v18, %v1417_v48  ;;  %v2032_v48 = vld [vmem:[%s4112_s5 + $0x1f8] sm:$0xff]  ;;  %v2002_v56 = vld [vmem:[%s4112_s5 + $0x108] sm:$0xff]  ;;  %v2001_v33 = vld [vmem:[%s4112_s5 + $0x100] sm:$0xff]  ;;  %vm2568_vm0 = vcmask 516096  }
 0x34e   : > { %3109 = vmatprep.subr.mxu1 %v2032_v48 }
 0x34f   : > { %v1899_v37 = vadd.f32 %v1898_v16, %v1897_v7  ;;  %v1907_v58 = vrot.slane %v1906_v31, 2  ;;  %3110 = vmatpush3.msra.mxu1 %v2016_v9  ;;  %v2017_v7 = vld [vmem:[%s4112_s5 + $0x180] sm:$0xff]  ;;  %v3227_v16 = vld [vmem:[%s4111_s4 + $0x18] sm:$0xff] }
 0x350   : > { %3111 = vmatprep.subr.mxu1 %v2031_v21 }
 0x351   : > { %v1900_v19 = vrot.slane %v1899_v37, 1  ;;  %v1908_v42 = vadd.f32 %v1907_v58, %v1906_v31  ;;  %3112 = vmatpush3.msra.mxu1 %v2015_v22 }
 0x352   : > { %3113 = vmatprep.subr.mxu1 %v2030_v8 }
 0x353   : > { %v1901_v20 = vadd.f32 %v1900_v19, %v1899_v37  ;;  %v1909_v2 = vrot.slane %v1908_v42, 1  ;;  %3114 = vmatpush3.msra.mxu1 %v2014_v44 }
 0x354   : > { %3115 = vmatprep.subr.mxu1 %v2029_v23 }
 0x355   : > { %v1910_v59 = vadd.f32 %v1909_v2, %v1908_v42  ;;  %v3893_v40 = vadd.f32 %v3887_v0, %v1901_v20  ;;  %3116 = vmatpush3.msra.mxu1 %v2013_v1 }
 0x356   : > { %3117 = vmatprep.subr.mxu1 %v2028_v27 }
 0x357   : > { %v3898_v3 = vadd.f32 %v3887_v0, %v1910_v59  ;;  %v1965_v10 = vmul.f32 %v1948_v57, %v3893_v40  ;;  %3118 = vmatpush3.msra.mxu1 %v2012_v26 }
 0x358   : > { %3119 = vmatprep.subr.mxu1 %v2027_v17 }
 0x359   : > { %v1966_v39 = vmul.f32 %v1952_v24, %v3898_v3  ;;  %3120 = vmatpush3.msra.mxu1 %v2011_v38 }
 0x35a   : > { %3121 = vmatprep.subr.mxu1 %v2026_v25 }
 0x35b   : > { %2097 = vmatprep.mubr.f32.mxu0 %v1966_v39  ;;  %3122 = vmatpush3.msra.mxu1 %v2010_v53 }
 0x35c   : > { %2098 = vmatmul.mubr.f32.vlgmr.msra.gmra.mxu0 %v1965_v10  ;;  %3123 = vmatprep.subr.mxu1 %v2025_v28 }
 0x35d   : > { %2428 = vmatpush1.msra.mxu0 %v3226_v52  ;;  %2461 = vmatprep.mubr.f32.mxu0 %v3259_v4 }
 0x35e   : > { %3124 = vmatpush3.msra.mxu1 %v2009_v29 }
 0x35f   : > { %3125 = vmatprep.subr.mxu1 %v2024_v12 }
 0x360   : > { %3126 = vmatpush3.msra.mxu1 %v2008_v6 }
 0x361   : > { %3127 = vmatprep.subr.mxu1 %v2023_v62 }
 0x362   : > { %3128 = vmatpush3.msra.mxu1 %v2007_v11 }
 0x363   : > { %3129 = vmatprep.subr.mxu1 %v2022_v50 }
 0x364   : > { %3130 = vmatpush3.msra.mxu1 %v2006_v46 }
 0x365   : > { %3131 = vmatprep.subr.mxu1 %v2021_v63 }
 0x366   : > { %3132 = vmatpush3.msra.mxu1 %v2005_v34 }
 0x367   : > { %3133 = vmatprep.subr.mxu1 %v2020_v5 }
 0x368   : > { %3134 = vmatpush3.msra.mxu1 %v2004_v35 }
 0x369   : > { %3135 = vmatprep.subr.mxu1 %v2019_v36 }
 0x36a   : > { %3136 = vmatpush3.msra.mxu1 %v2003_v13 }
 0x36b   : > { %3137 = vmatprep.subr.mxu1 %v2018_v55 }
 0x36c   : > { %3138 = vmatpush3.msra.mxu1 %v2002_v56 }
 0x36d   : > { %3139 = vmatprep.subr.mxu1 %v2017_v7  ;;  %v1960_v7 = vrot.slane %v3883_v18, %v1425_v61 }
 0x36e   : > { %3140 = vmatpush3.msra.mxu1 %v2001_v33 }
 0x36f   : > { %2498 = vmatprep.subr.mxu1 %v3227_v16 }
 0x405   : > { %v1818_v31 = vpop.f32.mrf.mxu1 }
 0x406   : > { %v1819_v58 = vadd.f32 %v1818_v31, %v3644_v41 }
 0x407   : > { %v1820_v37 = vpop.f32.mrf.mxu1 }
 0x408   : > { %v1821_v20 = vadd.f32 %v1820_v37, %v3644_v41  ;;  %v1839_v57 = vmax.f32 %v1819_v58, 0.0  ;;  %v3228_v58 = vld [vmem:[%s4111_s4 + $0x10] sm:$0xff] }
 0x409   : > { %v1822_v19 = vpop.f32.mrf.mxu1 }
 0x40a   : > { %v1823_v42 = vadd.f32 %v1822_v19, %v3650_v14  ;;  %v1840_v48 = vmax.f32 %v1821_v20, 0.0  ;;  %v1879_v44 = vmul.f32 %v3652_v45, %v1839_v57  ;;  %v3266_v57 = vmov 1966171168  }
 0x40b   : > { %v1824_v2 = vpop.f32.mrf.mxu1 }
 0x40c   : > { %v1843_v59 = vmax.f32 %v1823_v42, 0.0  ;;  %v1825_v24 = vadd.f32 %v1824_v2, %v3650_v14  ;;  %v1880_v26 = vmul.f32 %v3652_v45, %v1840_v48 }
 0x40d   : > { %v1828_v39 = vpop.f32.mrf.mxu1 }
 0x40e   : > { %v1844_v10 = vmax.f32 %v1825_v24, 0.0  ;;  %v1829_v52 = vadd.f32 %v1828_v39, %v3648_v43  ;;  %v1883_v21 = vmul.f32 %v3658_v51, %v1843_v59  ;;  %v2545_v39 = vunpack.c.l.s4 %v3266_v57 }
 0x40f   : > { %v1830_v9 = vpop.f32.mrf.mxu1 }
 0x410   : > { %v1847_v22 = vmax.f32 %v1829_v52, 0.0  ;;  %v1831_v8 = vadd.f32 %v1830_v9, %v3648_v43  ;;  %v1884_v41 = vmul.f32 %v3658_v51, %v1844_v10  ;;  %v1911_v38 = vadd.f32 %v1883_v21, %v1879_v44 }
 0x411   : > { %v1832_v23 = vpop.f32.mrf.mxu1  ;;  %v2546_v10 = vunpack.c.0.s8 %v2545_v39 }
 0x412   : > { %v1887_v1 = vmul.f32 %v3656_v49, %v1847_v22  ;;  %v1848_v14 = vmax.f32 %v1831_v8, 0.0  ;;  %v1833_v27 = vadd.f32 %v1832_v23, %v3654_v47  ;;  %v1920_v43 = vadd.f32 %v1884_v41, %v1880_v26 }
 0x413   : > { %v1834_v17 = vpop.f32.mrf.mxu1  ;;  %v2549_v52 = vsub.s32 %v2546_v10, %v3446_v30 }
 0x414   : > { %v1888_v25 = vmul.f32 %v3656_v49, %v1848_v14  ;;  %v1851_v53 = vmax.f32 %v1833_v27, 0.0  ;;  %v1835_v28 = vadd.f32 %v1834_v17, %v3654_v47  ;;  %v1912_v29 = vadd.f32 %v1911_v38, %v1887_v1 }
 0x416   : > { %v1891_v12 = vmul.f32 %v3662_v54, %v1851_v53  ;;  %v1852_v6 = vmax.f32 %v1835_v28, 0.0  ;;  %v1921_v51 = vadd.f32 %v1920_v43, %v1888_v25 }
 0x418   : > { %v1913_v62 = vadd.f32 %v1912_v29, %v1891_v12  ;;  %v1892_v11 = vmul.f32 %v3662_v54, %v1852_v6  ;;  %v1956_v54 = vrot.slane %v3883_v18, %v1421_v60 }
 0x41a   : > { %v1914_v50 = vrot.slane %v1913_v62, 4  ;;  %v1922_v46 = vadd.f32 %v1921_v51, %v1892_v11 }
 0x41c   : > { %v1915_v63 = vadd.f32 %v1914_v50, %v1913_v62  ;;  %v1923_v45 = vrot.slane %v1922_v46, 4  ;;  %v3106_v61 = vpop.f32.mrf.mxu0 }
 0x41e   : > { %v1916_v34 = vrot.slane %v1915_v63, 2  ;;  %v1924_v5 = vadd.f32 %v1923_v45, %v1922_v46  ;;  %v3107_v19 = vpop.f32.mrf.mxu0 }
 0x41f   : > { %v3108_v2 = vadd.f32 %v3107_v19, %v3106_v61 }
 0x420   : > { %v1917_v35 = vadd.f32 %v1916_v34, %v1915_v63  ;;  %v1925_v49 = vrot.slane %v1924_v5, 2 }
 0x422   : > { %v1918_v36 = vrot.slane %v1917_v35, 1  ;;  %v1926_v13 = vadd.f32 %v1925_v49, %v1924_v5 }
 0x424   : > { %v1919_v47 = vadd.f32 %v1918_v36, %v1917_v35  ;;  %v1927_v55 = vrot.slane %v1926_v13, 1 }
 0x426   : > { %v1928_v56 = vadd.f32 %v1927_v55, %v1926_v13  ;;  %v1941_v33 = vadd.f32 %v3887_v0, %v1919_v47 }
 0x428   : > { %v1942_v16 = vadd.f32 %v3887_v0, %v1928_v56  ;;  %v1967_v37 = vmul.f32 %v1956_v54, %v1941_v33 }
 0x42a   : > { %v1968_v31 = vmul.f32 %v1960_v7, %v1942_v16 }
 0x42c   : > { %2167 = vmatprep.mubr.f32.mxu1 %v1968_v31 }
 0x42d   : > { %2168 = vmatmul.mubr.f32.vlgmr.msra.gmra.mxu1 %v1967_v37 }
 0x42e   : > { %2499 = vmatpush1.msra.mxu1 %v3228_v58  ;;  %2532 = vmatprep.mubr.f32.mxu1 %v3259_v4 }
 0x4ed   : > { %v3141_v42 = vpop.f32.mrf.mxu1 }
 0x4ef   : > { %v3142_v20 = vpop.f32.mrf.mxu1 }
 0x4f0   : > { %v3143_v59 = vadd.f32 %v3142_v20, %v3141_v42 }
 0x4f2   : > { %v2170_v60 = vadd.f32 %v3143_v59, %v3108_v2 }
 0x4f4   : > { %v2173_v18 = vmul.f32 0.146, %v2170_v60 }
 0x4f6   : > { %v2392_v0 = vrot.slane %v2173_v18, %v3451_v32 }
 0x4f8   : > { %v2393_v24 = vmul.f32 %v2392_v0, %v3750_v15 }
 0x4fa   : > { %3043 = vmatmul.mubr.msk.f32.vlgmr.msra.gmra.mxu0 %vm1164_vm1, %v2393_v24  ;;  %3044 = vmatmul.mubr.msk.f32.vlgmr.msra.gmra.mxu1 %vm1164_vm1, %v2393_v24  ;;  %vm2716_vm1 = vcmask 130048  }
 0x4fb   : > { %2717 = vst.msk [vmem:[%s4052_s30] sm:$0xff] %vm2716_vm1, %v3259_v4  ;;  %2720 = vst.msk [vmem:[%s4052_s30 + $0x10] sm:$0xff] %vm2716_vm1, %v3259_v4 }
 0x502   : > { %v2722_v47 = vld [vmem:[%s4052_s30] sm:$0xff]  ;;  %v2723_v56 = vld [vmem:[%s4052_s30 + $0x10] sm:$0xff] }
 0x5ba   : > { %v2463_v48 = vpop.f32.mrf.mxu0  ;;  %v2534_v9 = vpop.f32.mrf.mxu1 }
 0x5bb   : > { %v2539_v21 = vmul.f32 %v2463_v48, %v3893_v40  ;;  %v2541_v22 = vmul.f32 %v2534_v9, %v1941_v33 }
 0x5bc   : > { %v2465_v8 = vpop.f32.mrf.mxu0  ;;  %v2536_v44 = vpop.f32.mrf.mxu1 }
 0x5bd   : > { %v2550_v23 = vrot.slane %v2539_v21, %v2549_v52  ;;  %v2637_v41 = vrot.slane %v2541_v22, %v2549_v52  ;;  %v2540_v15 = vmul.f32 %v2465_v8, %v3898_v3  ;;  %v2542_v1 = vmul.f32 %v2536_v44, %v1942_v16 }
 0x5bf   : > { %v2551_v14 = vcombine.high %v2550_v23, %v2550_v23  ;;  %v2558_v27 = vrot.slane %v2550_v23, %v2549_v52  ;;  %v2638_v26 = vcombine.high %v2637_v41, %v2637_v41  ;;  %v2645_v17 = vrot.slane %v2637_v41, %v2549_v52 }
 0x5c0   : > { %v2594_v38 = vrot.slane %v2540_v15, %v2549_v52  ;;  %v2680_v25 = vrot.slane %v2542_v1, %v2549_v52 }
 0x5c1   : > { %2569 = vst.msk [vmem:[#allocation2] sm:$0x1] %vm2568_vm0, %v2558_v27  ;;  %2655 = vst.msk [vmem:[#allocation2 + $0x4] sm:$0x1] %vm2568_vm0, %v2645_v17  ;;  %v2574_v30 = vrot.slane %v2558_v27, %v3451_v32  ;;  %v2565_v40 = vrot.slane %v2551_v14, %v2549_v52  ;;  %v2652_v53 = vrot.slane %v2638_v26, %v2549_v52 }
 0x5c2   : > { %v2595_v28 = vcombine.high %v2594_v38, %v2594_v38  ;;  %v2602_v43 = vrot.slane %v2594_v38, %v2549_v52  ;;  %v2681_v3 = vcombine.high %v2680_v25, %v2680_v25  ;;  %v2688_v29 = vrot.slane %v2680_v25, %v2549_v52 }
 0x5c3   : > { %2579 = vrot.lane.b32.xlu0 %v2574_v30, %s3267_s25  ;;  %v2578_v12 = vrot.slane %v2565_v40, %v3451_v32  ;;  %2570 = vst.msk [vmem:[#allocation2 + $0x8] sm:$0x1] %vm2568_vm0, %v2565_v40  ;;  %2656 = vst.msk [vmem:[#allocation2 + $0xc] sm:$0x1] %vm2568_vm0, %v2652_v53  ;;  %v2660_v62 = vrot.slane %v2645_v17, %v3451_v32  ;;  %v2664_v11 = vrot.slane %v2652_v53, %v3451_v32 }
 0x5c4   : > { %2612 = vst.msk [vmem:[#allocation2 + $0x2] sm:$0x1] %vm2568_vm0, %v2602_v43  ;;  %2698 = vst.msk [vmem:[#allocation2 + $0x6] sm:$0x1] %vm2568_vm0, %v2688_v29  ;;  %v2609_v6 = vrot.slane %v2595_v28, %v2549_v52  ;;  %v2695_v51 = vrot.slane %v2681_v3, %v2549_v52  ;;  %v2617_v50 = vrot.slane %v2602_v43, %v3451_v32 }
 0x5c5   : > { %2581 = vrot.lane.b32.xlu1 %v2578_v12, %s3267_s25  ;;  %v2703_v63 = vrot.slane %v2688_v29, %v3451_v32 }
 0x5c6   : > { %2613 = vst.msk [vmem:[#allocation2 + $0xa] sm:$0x1] %vm2568_vm0, %v2609_v6  ;;  %2699 = vst.msk [vmem:[#allocation2 + $0xe] sm:$0x1] %vm2568_vm0, %v2695_v51  ;;  %v2621_v46 = vrot.slane %v2609_v6, %v3451_v32  ;;  %v2707_v45 = vrot.slane %v2695_v51, %v3451_v32 }
 0x5c7   : > { %2665 = vrot.lane.b32.xlu0 %v2660_v62, %s3267_s25 }
 0x5c9   : > { %2667 = vrot.lane.b32.xlu1 %v2664_v11, %s3267_s25 }
 0x5cb   : > { %2622 = vrot.lane.b32.xlu0 %v2617_v50, %s3267_s25 }
 0x5cd   : > { %2624 = vrot.lane.b32.xlu1 %v2621_v46, %s3267_s25 }
 0x5cf   : > { %2708 = vrot.lane.b32.xlu0 %v2703_v63, %s3267_s25 }
 0x5d1   : > { %2710 = vrot.lane.b32.xlu1 %v2707_v45, %s3267_s25 }
 0x635   : > { %v2580_v34 = vpop.permute.xlu0 %2579 }
 0x636   : > { %2585 = vst.msk [vmem:[#allocation2 + $0x1] sm:$0x1] %vm2568_vm0, %v2580_v34 }
 0x637   : > { %v2582_v5 = vpop.permute.xlu1 %2581 }
 0x638   : > { %2586 = vst.msk [vmem:[#allocation2 + $0x9] sm:$0x1] %vm2568_vm0, %v2582_v5 }
 0x639   : > { %v2666_v35 = vpop.permute.xlu0 %2665 }
 0x63a   : > { %2671 = vst.msk [vmem:[#allocation2 + $0x5] sm:$0x1] %vm2568_vm0, %v2666_v35 }
 0x63b   : > { %v2668_v49 = vpop.permute.xlu1 %2667 }
 0x63c   : > { %2672 = vst.msk [vmem:[#allocation2 + $0xd] sm:$0x1] %vm2568_vm0, %v2668_v49 }
 0x63d   : > { %v2623_v32 = vpop.permute.xlu0 %2622 }
 0x63e   : > { %2628 = vst.msk [vmem:[#allocation2 + $0x3] sm:$0x1] %vm2568_vm0, %v2623_v32 }
 0x63f   : > { %v2625_v36 = vpop.permute.xlu1 %2624 }
 0x640   : > { %2629 = vst.msk [vmem:[#allocation2 + $0xb] sm:$0x1] %vm2568_vm0, %v2625_v36 }
 0x641   : > { %v2709_v4 = vpop.permute.xlu0 %2708 }
 0x642   : > { %2714 = vst.msk [vmem:[#allocation2 + $0x7] sm:$0x1] %vm2568_vm0, %v2709_v4 }
 0x643   : > { %v2711_v13 = vpop.permute.xlu1 %2710 }
 0x644   : > { %2715 = vst.msk [vmem:[#allocation2 + $0xf] sm:$0x1] %vm2568_vm0, %v2711_v13 }
 0x649   : > { %v2732_v55 = vld [vmem:[#allocation2] sm:$0xff] }
 0x64a   : > { %2736 = vrot.lane.b32.xlu0 %v2732_v55, %s3268_s2  ;;  %v2726_v7 = vadd.f32 %v2732_v55, %v2722_v47 }
 0x64b   : > { %v2733_v33 = vld [vmem:[#allocation2 + $0x8] sm:$0xff] }
 0x64c   : > { %2738 = vrot.lane.b32.xlu1 %v2733_v33, %s3268_s2  ;;  %2728 = vst.msk [vmem:[%s4052_s30] sm:$0xff] %vm2716_vm1, %v2726_v7  ;;  %v2727_v54 = vadd.f32 %v2733_v33, %v2723_v56 }
 0x64e   : > { %2752 = vrot.lane.b32.xlu0 %v2732_v55, %s3269_s0  ;;  %2729 = vst.msk [vmem:[%s4052_s30 + $0x10] sm:$0xff] %vm2716_vm1, %v2727_v54 }
 0x650   : > { %2754 = vrot.lane.b32.xlu1 %v2733_v33, %s3269_s0 }
 0x652   : > { %2768 = vrot.lane.b32.xlu0 %v2732_v55, %s3270_s28 }
 0x653   : > { %v2730_v31 = vld [vmem:[%s4052_s30 + $0x1] sm:$0xff] }
 0x654   : > { %2770 = vrot.lane.b32.xlu1 %v2733_v33, %s3270_s28 }
 0x655   : > { %v2731_v61 = vld [vmem:[%s4052_s30 + $0x11] sm:$0xff] }
 0x6bc   : > { %v2737_v16 = vpop.permute.xlu0 %2736 }
 0x6bd   : > { %v2742_v37 = vadd.f32 %v2737_v16, %v2730_v31 }
 0x6be   : > { %v2739_v58 = vpop.permute.xlu1 %2738 }
 0x6bf   : > { %2744 = vst.msk [vmem:[%s4052_s30 + $0x1] sm:$0xff] %vm2716_vm1, %v2742_v37  ;;  %v2743_v19 = vadd.f32 %v2739_v58, %v2731_v61 }
 0x6c0   : > { %v2753_v42 = vpop.permute.xlu0 %2752 }
 0x6c1   : > { %2745 = vst.msk [vmem:[%s4052_s30 + $0x11] sm:$0xff] %vm2716_vm1, %v2743_v19 }
 0x6c2   : > { %v2755_v59 = vpop.permute.xlu1 %2754 }
 0x6c4   : > { %v2769_v0 = vpop.permute.xlu0 %2768 }
 0x6c6   : > { %v2746_v20 = vld [vmem:[%s4052_s30 + $0x2] sm:$0xff]  ;;  %v2771_v39 = vpop.permute.xlu1 %2770 }
 0x6c7   : > { %v2758_v2 = vadd.f32 %v2753_v42, %v2746_v20 }
 0x6c8   : > { %v2747_v60 = vld [vmem:[%s4052_s30 + $0x12] sm:$0xff] }
 0x6c9   : > { %2760 = vst.msk [vmem:[%s4052_s30 + $0x2] sm:$0xff] %vm2716_vm1, %v2758_v2  ;;  %v2759_v18 = vadd.f32 %v2755_v59, %v2747_v60 }
 0x6cb   : > { %2761 = vst.msk [vmem:[%s4052_s30 + $0x12] sm:$0xff] %vm2716_vm1, %v2759_v18 }
 0x6d0   : > { %v2762_v24 = vld [vmem:[%s4052_s30 + $0x3] sm:$0xff] }
 0x6d1   : > { %v2774_v57 = vadd.f32 %v2769_v0, %v2762_v24 }
 0x6d2   : > { %v2763_v10 = vld [vmem:[%s4052_s30 + $0x13] sm:$0xff] }
 0x6d3   : > { %2776 = vst.msk [vmem:[%s4052_s30 + $0x3] sm:$0xff] %vm2716_vm1, %v2774_v57  ;;  %v2775_v52 = vadd.f32 %v2771_v39, %v2763_v10 }
 0x6d5   : > { %2777 = vst.msk [vmem:[%s4052_s30 + $0x13] sm:$0xff] %vm2716_vm1, %v2775_v52 }
 0x6d6 PF: > { %s29_s27 = sadd.s32 1, %s3254_s27  }
 0x6d7   : > { %p26_p1 = scmp.ge.s32.totalorder %s29_s27, 4  }
 0x6d9   :  { %28 = sbr.rel (!%p26_p1) target bundleno = 5 (0x5), region = 164 }
 0x6de   :  { %2799 = vsyncpa [#allocation4], 1 }
 0x6df   :  { %2801 = vsyncpa [#allocation4 + $0x1], 1 }

</bundles_post_ra>
